<compile_context>
chip_gen: v6e
topology: v6e:2x2x1
jax: 0.10.0
libtpu: 0.0.40
codegen_flags: <defaults>
</compile_context>

<pallas_src>
import functools

import jax
import jax.numpy as jnp
from jax.experimental import pallas as pl
from jax.experimental.pallas import tpu as pltpu


def _cconvT_kernel(x_ref, xh_ref, w_ref, b_ref, o_ref, *, tap_offsets, tm):
    # x_ref : (2Cin, TM)        bf16  current activation block
    # xh_ref: (2Cin, TMH)       bf16  halo block (the next TMH lanes)
    # w_ref : (T, 2Cout, 2Cin)  bf16  folded complex tap weights
    # b_ref : (2Cout, 1)        f32   folded biases
    # o_ref : (2Cout, TM)             fused real/imag output block
    xx = jnp.concatenate([x_ref[...], xh_ref[...]], axis=-1)   # (2Cin, TM+TMH)
    acc = None
    for t, off in enumerate(tap_offsets):                      # static KH*KW loop
        xw = xx[:, off:off + tm]                               # shifted tap window
        part = jnp.dot(w_ref[t], xw, preferred_element_type=jnp.float32)
        acc = part if acc is None else acc + part
    o_ref[...] = (acc + b_ref[...]).astype(o_ref.dtype)


def _pad_or_crop(x, axis, before, after):
    """jnp.pad that also accepts negative widths (crops instead)."""
    if before < 0:
        x = jax.lax.slice_in_dim(x, -before, x.shape[axis], axis=axis)
        before = 0
    if after < 0:
        x = jax.lax.slice_in_dim(x, 0, x.shape[axis] + after, axis=axis)
        after = 0
    if before or after:
        pads = [(0, 0)] * x.ndim
        pads[axis] = (before, after)
        x = jnp.pad(x, pads)
    return x


def _round_up(x, m):
    return -(-x // m) * m


def _pick_tm(m_goal, tmh, c_in2, c_out2, out_itemsize,
             vmem_budget=8 * 1024 * 1024, cap=2048):
    """Largest lane tile (multiple of TMH >= 128) whose double-buffered working
    set fits a conservative VMEM budget (safe for v7x 64MiB / v5e 16MiB scoped)."""
    per_lane = 2 * (c_in2 * 2 + c_out2 * out_itemsize)   # x-in + out, double buffered
    tm = min(vmem_budget // per_lane, max(cap, tmh), _round_up(m_goal, tmh))
    return max(tmh, (tm // tmh) * tmh)


def complex_conv_transpose2d(x_r, x_i, w_r, w_i, b_r, b_i,
                             stride=1, padding=0, output_padding=0,
                             out_dtype=jnp.float32):
    """x_*: (N, Cin, H, W); w_*: (Cin, Cout, KH, KW) (PyTorch layout); b_*: (Cout,)."""
    # TODO(synk): groups != 1 and dilation != 1 are not implemented (module defaults).
    N, Cin, H, W = x_r.shape
    Cin_w, Cout, KH, KW = w_r.shape
    assert Cin == Cin_w
    Ho = (H - 1) * stride - 2 * padding + (KH - 1) + output_padding + 1
    Wo = (W - 1) * stride - 2 * padding + (KW - 1) + output_padding + 1
    assert Ho > 0 and Wo > 0
    C2, CO2 = 2 * Cin, 2 * Cout

    # ---------------- wrapper prep (XLA, channels-first, bf16) ----------------
    x = jnp.concatenate([x_r, x_i], axis=1).astype(jnp.bfloat16)    # (N, 2Cin, H, W)

    if stride > 1:
        # zero-dilation via pad + reshape (no scatter).
        # TODO(synk): a polyphase (sub-pixel) decomposition would avoid reading the
        # stride^2 structural zeros; kernel is HBM-bound, kept dense for robustness.
        x = x.reshape(N, C2, H, 1, W, 1)
        x = jnp.pad(x, ((0, 0), (0, 0), (0, 0), (0, stride - 1),
                        (0, 0), (0, stride - 1)))
        x = x.reshape(N, C2, H * stride, W * stride)
        x = x[:, :, :(H - 1) * stride + 1, :(W - 1) * stride + 1]

    # conv-transpose == stride-1 correlation of the dilated input, padded by
    # (K-1-p) before / (K-1-p+output_padding) after (negative -> crop).
    x = _pad_or_crop(x, 2, KH - 1 - padding, KH - 1 - padding + output_padding)
    x = _pad_or_crop(x, 3, KW - 1 - padding, KW - 1 - padding + output_padding)
    Hp, Wp = x.shape[2], x.shape[3]
    assert Hp == Ho + KH - 1 and Wp == Wo + KW - 1

    # Flatten spatial on the padded width Wp: output pixel p = h*Wp + w reads
    # input pixel p + (kh*Wp + kw) for tap (kh, kw) -- a constant lane offset.
    m_goal = Ho * Wp                          # rows actually needed (crop width later)
    max_off = (KH - 1) * Wp + (KW - 1)        # largest tap offset
    TMH = _round_up(max(max_off, 1), 128)     # lane-aligned halo block
    TM = _pick_tm(m_goal, TMH, C2, CO2, jnp.dtype(out_dtype).itemsize)
    num_m = -(-m_goal // TM)
    Mk = num_m * TM
    L = Mk + TMH
    ratio = TM // TMH

    x_flat = x.reshape(N, C2, Hp * Wp)
    x_flat = jnp.pad(x_flat, ((0, 0), (0, 0), (0, L - Hp * Wp)))

    def prep_w(w):                            # -> (KH*KW, Cout, Cin), spatially flipped
        w = jnp.flip(w, axis=(2, 3))
        w = jnp.transpose(w, (2, 3, 1, 0))                 # (KH, KW, Cout, Cin)
        return w.reshape(KH * KW, Cout, Cin)

    wr, wi = prep_w(w_r), prep_w(w_i)
    w_col = jnp.concatenate(
        [jnp.concatenate([wr, -wi], axis=2),               # rows -> real output
         jnp.concatenate([wi,  wr], axis=2)],              # rows -> imag output
        axis=1).astype(jnp.bfloat16)                       # (T, 2Cout, 2Cin)
    # Each real ConvTranspose2d adds its own bias (see module): fold them.
    b_col = jnp.concatenate([b_r - b_i, b_r + b_i]).reshape(CO2, 1).astype(jnp.float32)

    tap_offsets = tuple(kh * Wp + kw for kh in range(KH) for kw in range(KW))
    T = KH * KW

    flops = 2 * N * Mk * C2 * CO2 * T
    bytes_accessed = (N * C2 * (Mk + num_m * TMH) * 2
                      + N * CO2 * Mk * jnp.dtype(out_dtype).itemsize
                      + T * CO2 * C2 * 2 + CO2 * 4)

    kernel = functools.partial(_cconvT_kernel, tap_offsets=tap_offsets, tm=TM)
    out = pl.pallas_call(
        kernel,
        out_shape=jax.ShapeDtypeStruct((N, CO2, Mk), out_dtype),
        grid_spec=pltpu.PrefetchScalarGridSpec(
            num_scalar_prefetch=0,
            grid=(N, num_m),
            in_specs=[
                pl.BlockSpec((None, C2, TM), lambda n, m: (n, 0, m)),
                pl.BlockSpec((None, C2, TMH), lambda n, m: (n, 0, (m + 1) * ratio)),
                pl.BlockSpec((T, CO2, C2), lambda n, m: (0, 0, 0)),
                pl.BlockSpec((CO2, 1), lambda n, m: (0, 0)),
            ],
            out_specs=pl.BlockSpec((None, CO2, TM), lambda n, m: (n, 0, m)),
        ),
        compiler_params=pltpu.CompilerParams(
            dimension_semantics=("parallel", "parallel"),
            vmem_limit_bytes=32 * 1024 * 1024),
        cost_estimate=pl.CostEstimate(flops=flops, transcendentals=0,
                                      bytes_accessed=bytes_accessed),
    )(x_flat, x_flat, w_col, b_col)

    # Crop padded-width columns + split fused halves (cheap XLA slices, no transpose).
    out = out[:, :, :m_goal].reshape(N, CO2, Ho, Wp)[:, :, :, :Wo]
    return out[:, :Cout], out[:, Cout:]


def _ref_conv_transpose(x, w_pt, b, stride, padding, output_padding):
    """Pure-JAX reference matching PyTorch ConvTranspose2d semantics (f32)."""
    KH, KW = w_pt.shape[2], w_pt.shape[3]
    w = jnp.transpose(jnp.flip(w_pt, axis=(2, 3)), (1, 0, 2, 3))   # (Cout,Cin,KH,KW)
    pad = ((KH - 1 - padding, KH - 1 - padding + output_padding),
           (KW - 1 - padding, KW - 1 - padding + output_padding))
    y = jax.lax.conv_general_dilated(
        x, w, window_strides=(1, 1), padding=pad,
        lhs_dilation=(stride, stride),
        dimension_numbers=('NCHW', 'OIHW', 'NCHW'),
        preferred_element_type=jnp.float32)
    return y + b[None, :, None, None]


if __name__ == "__main__":
    # ComplexConvTranspose2d(in_channels=4, out_channels=6, kernel_size=3,
    #                        stride=2, padding=1, output_padding=1, bias=True)
    N, Cin, H, W = 2, 4, 16, 16
    Cout, K = 6, 3
    stride, padding, output_padding = 2, 1, 1

    key = jax.random.PRNGKey(0)
    k1, k2, k3, k4, k5, k6 = jax.random.split(key, 6)
    x_r = jax.random.normal(k1, (N, Cin, H, W), jnp.float32)
    x_i = jax.random.normal(k2, (N, Cin, H, W), jnp.float32)
    scale = 1.0 / jnp.sqrt(Cin * K * K)
    w_r = jax.random.uniform(k3, (Cin, Cout, K, K), jnp.float32, -scale, scale)
    w_i = jax.random.uniform(k4, (Cin, Cout, K, K), jnp.float32, -scale, scale)
    b_r = jax.random.uniform(k5, (Cout,), jnp.float32, -scale, scale)
    b_i = jax.random.uniform(k6, (Cout,), jnp.float32, -scale, scale)

    fwd = jax.jit(functools.partial(
        complex_conv_transpose2d,
        stride=stride, padding=padding, output_padding=output_padding))
    out_r, out_i = fwd(x_r, x_i, w_r, w_i, b_r, b_i)
    jax.block_until_ready((out_r, out_i))

    # Reference uses the same bf16-rounded inputs (kernel uses bf16 operands
    # with f32 accumulation), so only summation-order differences remain.
    def rnd(a):
        return a.astype(jnp.bfloat16).astype(jnp.float32)
    xr_h, xi_h, wr_h, wi_h = rnd(x_r), rnd(x_i), rnd(w_r), rnd(w_i)
    ref_r = (_ref_conv_transpose(xr_h, wr_h, b_r, stride, padding, output_padding)
             - _ref_conv_transpose(xi_h, wi_h, b_i, stride, padding, output_padding))
    ref_i = (_ref_conv_transpose(xi_h, wr_h, b_r, stride, padding, output_padding)
             + _ref_conv_transpose(xr_h, wi_h, b_i, stride, padding, output_padding))

    Ho = (H - 1) * stride - 2 * padding + (K - 1) + output_padding + 1
    assert out_r.shape == (N, Cout, Ho, Ho) and out_i.shape == (N, Cout, Ho, Ho)
    assert jnp.allclose(out_r, ref_r, atol=1e-3, rtol=1e-3)
    assert jnp.allclose(out_i, ref_i, atol=1e-3, rtol=1e-3)
    print("KERNEL_OK")
</pallas_src>

<mosaic_0001>
module attributes {stable_mosaic.version = 11 : i64} {
  func.func @_cconvT_kernel(%arg0: i32, %arg1: i32, %arg2: memref<1x8x1152xbf16, #tpu.memory_space<vmem>>, %arg3: memref<1x8x128xbf16, #tpu.memory_space<vmem>>, %arg4: memref<9x12x8xbf16, #tpu.memory_space<vmem>>, %arg5: memref<12x1xf32, #tpu.memory_space<vmem>>, %arg6: memref<1x12x1152xf32, #tpu.memory_space<vmem>>) attributes {dimension_semantics = [#tpu.dimension_semantics<parallel>, #tpu.dimension_semantics<parallel>], iteration_bounds = array<i64: 2, 1>, scalar_prefetch = 0 : i64, scratch_operands = 0 : i64, tpu.core_type = #tpu.core_type<tc>, window_params = [{transform_indices = @transform_0, window_bounds = array<i64: 1, 8, 1152>}, {transform_indices = @transform_1, window_bounds = array<i64: 1, 8, 128>}, {pipeline_mode = #tpu.pipeline_mode<synchronous>, transform_indices = @transform_2, window_bounds = array<i64: 9, 12, 8>}, {pipeline_mode = #tpu.pipeline_mode<synchronous>, transform_indices = @transform_3, window_bounds = array<i64: 12, 1>}, {transform_indices = @transform_4, window_bounds = array<i64: 1, 12, 1152>}]} {
    %c0 = arith.constant 0 : index
    %c0_0 = arith.constant 0 : index
    %c0_1 = arith.constant 0 : index
    %0 = vector.load %arg2[%c0, %c0_0, %c0_1] : memref<1x8x1152xbf16, #tpu.memory_space<vmem>>, vector<1x8x1152xbf16>
    %1 = vector.shape_cast %0 : vector<1x8x1152xbf16> to vector<8x1152xbf16>
    %c0_2 = arith.constant 0 : index
    %c0_3 = arith.constant 0 : index
    %c0_4 = arith.constant 0 : index
    %2 = vector.load %arg3[%c0_2, %c0_3, %c0_4] : memref<1x8x128xbf16, #tpu.memory_space<vmem>>, vector<1x8x128xbf16>
    %3 = vector.shape_cast %2 : vector<1x8x128xbf16> to vector<8x128xbf16>
    %4 = tpu.concatenate %1, %3 in 1 : vector<8x1152xbf16>, vector<8x128xbf16> -> vector<8x1280xbf16>
    %5 = vector.extract_strided_slice %4 {offsets = [0, 0], sizes = [8, 1152], strides = [1, 1]} : vector<8x1280xbf16> to vector<8x1152xbf16>
    %c0_5 = arith.constant 0 : index
    %c0_6 = arith.constant 0 : index
    %c0_7 = arith.constant 0 : index
    %6 = vector.load %arg4[%c0_5, %c0_6, %c0_7] : memref<9x12x8xbf16, #tpu.memory_space<vmem>>, vector<1x12x8xbf16>
    %7 = vector.shape_cast %6 : vector<1x12x8xbf16> to vector<12x8xbf16>
    %cst = arith.constant dense<0.000000e+00> : vector<12x1152xf32>
    %8 = tpu.matmul %7, %5, %cst {dimension_numbers = #tpu.dot_dimension_numbers<[1], [0], [0], [1], [0, 0, 1, 1], [], []>} : vector<12x8xbf16>, vector<8x1152xbf16>, vector<12x1152xf32> -> vector<12x1152xf32>
    %9 = vector.extract_strided_slice %4 {offsets = [0, 1], sizes = [8, 1152], strides = [1, 1]} : vector<8x1280xbf16> to vector<8x1152xbf16>
    %c1 = arith.constant 1 : index
    %c0_8 = arith.constant 0 : index
    %c0_9 = arith.constant 0 : index
    %10 = vector.load %arg4[%c1, %c0_8, %c0_9] : memref<9x12x8xbf16, #tpu.memory_space<vmem>>, vector<1x12x8xbf16>
    %11 = vector.shape_cast %10 : vector<1x12x8xbf16> to vector<12x8xbf16>
    %cst_10 = arith.constant dense<0.000000e+00> : vector<12x1152xf32>
    %12 = tpu.matmul %11, %9, %cst_10 {dimension_numbers = #tpu.dot_dimension_numbers<[1], [0], [0], [1], [0, 0, 1, 1], [], []>} : vector<12x8xbf16>, vector<8x1152xbf16>, vector<12x1152xf32> -> vector<12x1152xf32>
    %13 = arith.addf %8, %12 : vector<12x1152xf32>
    %14 = vector.extract_strided_slice %4 {offsets = [0, 2], sizes = [8, 1152], strides = [1, 1]} : vector<8x1280xbf16> to vector<8x1152xbf16>
    %c2 = arith.constant 2 : index
    %c0_11 = arith.constant 0 : index
    %c0_12 = arith.constant 0 : index
    %15 = vector.load %arg4[%c2, %c0_11, %c0_12] : memref<9x12x8xbf16, #tpu.memory_space<vmem>>, vector<1x12x8xbf16>
    %16 = vector.shape_cast %15 : vector<1x12x8xbf16> to vector<12x8xbf16>
    %cst_13 = arith.constant dense<0.000000e+00> : vector<12x1152xf32>
    %17 = tpu.matmul %16, %14, %cst_13 {dimension_numbers = #tpu.dot_dimension_numbers<[1], [0], [0], [1], [0, 0, 1, 1], [], []>} : vector<12x8xbf16>, vector<8x1152xbf16>, vector<12x1152xf32> -> vector<12x1152xf32>
    %18 = arith.addf %13, %17 : vector<12x1152xf32>
    %19 = vector.extract_strided_slice %4 {offsets = [0, 34], sizes = [8, 1152], strides = [1, 1]} : vector<8x1280xbf16> to vector<8x1152xbf16>
    %c3 = arith.constant 3 : index
    %c0_14 = arith.constant 0 : index
    %c0_15 = arith.constant 0 : index
    %20 = vector.load %arg4[%c3, %c0_14, %c0_15] : memref<9x12x8xbf16, #tpu.memory_space<vmem>>, vector<1x12x8xbf16>
    %21 = vector.shape_cast %20 : vector<1x12x8xbf16> to vector<12x8xbf16>
    %cst_16 = arith.constant dense<0.000000e+00> : vector<12x1152xf32>
    %22 = tpu.matmul %21, %19, %cst_16 {dimension_numbers = #tpu.dot_dimension_numbers<[1], [0], [0], [1], [0, 0, 1, 1], [], []>} : vector<12x8xbf16>, vector<8x1152xbf16>, vector<12x1152xf32> -> vector<12x1152xf32>
    %23 = arith.addf %18, %22 : vector<12x1152xf32>
    %24 = vector.extract_strided_slice %4 {offsets = [0, 35], sizes = [8, 1152], strides = [1, 1]} : vector<8x1280xbf16> to vector<8x1152xbf16>
    %c4 = arith.constant 4 : index
    %c0_17 = arith.constant 0 : index
    %c0_18 = arith.constant 0 : index
    %25 = vector.load %arg4[%c4, %c0_17, %c0_18] : memref<9x12x8xbf16, #tpu.memory_space<vmem>>, vector<1x12x8xbf16>
    %26 = vector.shape_cast %25 : vector<1x12x8xbf16> to vector<12x8xbf16>
    %cst_19 = arith.constant dense<0.000000e+00> : vector<12x1152xf32>
    %27 = tpu.matmul %26, %24, %cst_19 {dimension_numbers = #tpu.dot_dimension_numbers<[1], [0], [0], [1], [0, 0, 1, 1], [], []>} : vector<12x8xbf16>, vector<8x1152xbf16>, vector<12x1152xf32> -> vector<12x1152xf32>
    %28 = arith.addf %23, %27 : vector<12x1152xf32>
    %29 = vector.extract_strided_slice %4 {offsets = [0, 36], sizes = [8, 1152], strides = [1, 1]} : vector<8x1280xbf16> to vector<8x1152xbf16>
    %c5 = arith.constant 5 : index
    %c0_20 = arith.constant 0 : index
    %c0_21 = arith.constant 0 : index
    %30 = vector.load %arg4[%c5, %c0_20, %c0_21] : memref<9x12x8xbf16, #tpu.memory_space<vmem>>, vector<1x12x8xbf16>
    %31 = vector.shape_cast %30 : vector<1x12x8xbf16> to vector<12x8xbf16>
    %cst_22 = arith.constant dense<0.000000e+00> : vector<12x1152xf32>
    %32 = tpu.matmul %31, %29, %cst_22 {dimension_numbers = #tpu.dot_dimension_numbers<[1], [0], [0], [1], [0, 0, 1, 1], [], []>} : vector<12x8xbf16>, vector<8x1152xbf16>, vector<12x1152xf32> -> vector<12x1152xf32>
    %33 = arith.addf %28, %32 : vector<12x1152xf32>
    %34 = vector.extract_strided_slice %4 {offsets = [0, 68], sizes = [8, 1152], strides = [1, 1]} : vector<8x1280xbf16> to vector<8x1152xbf16>
    %c6 = arith.constant 6 : index
    %c0_23 = arith.constant 0 : index
    %c0_24 = arith.constant 0 : index
    %35 = vector.load %arg4[%c6, %c0_23, %c0_24] : memref<9x12x8xbf16, #tpu.memory_space<vmem>>, vector<1x12x8xbf16>
    %36 = vector.shape_cast %35 : vector<1x12x8xbf16> to vector<12x8xbf16>
    %cst_25 = arith.constant dense<0.000000e+00> : vector<12x1152xf32>
    %37 = tpu.matmul %36, %34, %cst_25 {dimension_numbers = #tpu.dot_dimension_numbers<[1], [0], [0], [1], [0, 0, 1, 1], [], []>} : vector<12x8xbf16>, vector<8x1152xbf16>, vector<12x1152xf32> -> vector<12x1152xf32>
    %38 = arith.addf %33, %37 : vector<12x1152xf32>
    %39 = vector.extract_strided_slice %4 {offsets = [0, 69], sizes = [8, 1152], strides = [1, 1]} : vector<8x1280xbf16> to vector<8x1152xbf16>
    %c7 = arith.constant 7 : index
    %c0_26 = arith.constant 0 : index
    %c0_27 = arith.constant 0 : index
    %40 = vector.load %arg4[%c7, %c0_26, %c0_27] : memref<9x12x8xbf16, #tpu.memory_space<vmem>>, vector<1x12x8xbf16>
    %41 = vector.shape_cast %40 : vector<1x12x8xbf16> to vector<12x8xbf16>
    %cst_28 = arith.constant dense<0.000000e+00> : vector<12x1152xf32>
    %42 = tpu.matmul %41, %39, %cst_28 {dimension_numbers = #tpu.dot_dimension_numbers<[1], [0], [0], [1], [0, 0, 1, 1], [], []>} : vector<12x8xbf16>, vector<8x1152xbf16>, vector<12x1152xf32> -> vector<12x1152xf32>
    %43 = arith.addf %38, %42 : vector<12x1152xf32>
    %44 = vector.extract_strided_slice %4 {offsets = [0, 70], sizes = [8, 1152], strides = [1, 1]} : vector<8x1280xbf16> to vector<8x1152xbf16>
    %c8 = arith.constant 8 : index
    %c0_29 = arith.constant 0 : index
    %c0_30 = arith.constant 0 : index
    %45 = vector.load %arg4[%c8, %c0_29, %c0_30] : memref<9x12x8xbf16, #tpu.memory_space<vmem>>, vector<1x12x8xbf16>
    %46 = vector.shape_cast %45 : vector<1x12x8xbf16> to vector<12x8xbf16>
    %cst_31 = arith.constant dense<0.000000e+00> : vector<12x1152xf32>
    %47 = tpu.matmul %46, %44, %cst_31 {dimension_numbers = #tpu.dot_dimension_numbers<[1], [0], [0], [1], [0, 0, 1, 1], [], []>} : vector<12x8xbf16>, vector<8x1152xbf16>, vector<12x1152xf32> -> vector<12x1152xf32>
    %48 = arith.addf %43, %47 : vector<12x1152xf32>
    %c0_32 = arith.constant 0 : index
    %c0_33 = arith.constant 0 : index
    %49 = vector.load %arg5[%c0_32, %c0_33] : memref<12x1xf32, #tpu.memory_space<vmem>>, vector<12x1xf32>
    %50 = vector.broadcast %49 : vector<12x1xf32> to vector<12x1152xf32>
    %51 = arith.addf %48, %50 : vector<12x1152xf32>
    %c0_34 = arith.constant 0 : index
    %c0_35 = arith.constant 0 : index
    %c0_36 = arith.constant 0 : index
    %52 = vector.load %arg6[%c0_34, %c0_35, %c0_36] : memref<1x12x1152xf32, #tpu.memory_space<vmem>>, vector<1x12x1152xf32>
    %53 = vector.shape_cast %52 : vector<1x12x1152xf32> to vector<12x1152xf32>
    %54 = vector.shape_cast %51 : vector<12x1152xf32> to vector<1x12x1152xf32>
    tpu.vector_store %arg6[%c0_34, %c0_35, %c0_36], %54 {strides = array<i32>} : memref<1x12x1152xf32, #tpu.memory_space<vmem>>, vector<1x12x1152xf32>,
    return
  }
  func.func @transform_0(%arg0: i32, %arg1: i32) -> (i32, i32, i32) {
    %c0_i32 = arith.constant 0 : i32
    %c0_i32_0 = arith.constant 0 : i32
    return %arg0, %c0_i32, %arg1 : i32, i32, i32
  }
  func.func @transform_1(%arg0: i32, %arg1: i32) -> (i32, i32, i32) {
    %c1_i32 = arith.constant 1 : i32
    %0 = arith.addi %arg1, %c1_i32 : i32
    %c9_i32 = arith.constant 9 : i32
    %1 = arith.muli %0, %c9_i32 : i32
    %c0_i32 = arith.constant 0 : i32
    %c0_i32_0 = arith.constant 0 : i32
    return %arg0, %c0_i32, %1 : i32, i32, i32
  }
  func.func @transform_2(%arg0: i32, %arg1: i32) -> (i32, i32, i32) {
    %c0_i32 = arith.constant 0 : i32
    %c0_i32_0 = arith.constant 0 : i32
    %c0_i32_1 = arith.constant 0 : i32
    %c0_i32_2 = arith.constant 0 : i32
    return %c0_i32, %c0_i32_0, %c0_i32_1 : i32, i32, i32
  }
  func.func @transform_3(%arg0: i32, %arg1: i32) -> (i32, i32) {
    %c0_i32 = arith.constant 0 : i32
    %c0_i32_0 = arith.constant 0 : i32
    %c0_i32_1 = arith.constant 0 : i32
    return %c0_i32, %c0_i32_0 : i32, i32
  }
  func.func @transform_4(%arg0: i32, %arg1: i32) -> (i32, i32, i32) {
    %c0_i32 = arith.constant 0 : i32
    %c0_i32_0 = arith.constant 0 : i32
    return %arg0, %c0_i32, %arg1 : i32, i32, i32
  }
}

</mosaic_0001>

<bundles_post_ra>
// kernel: complex_conv_transpose2d.1
= control target key start
LH: loop header
LB: loop body
LE: loop exit
PB: predicated region body
PF: predicated region fallthrough
CT: control target
= control target key end

     0   :  { %s3430_s15 = smov 0   ;;  %s3432_s16 = smov 0   ;;  %s4081_s0 = inlined_call_operand.vmem [shape: bf16[2,8,1280], index: 0, kind: input, shape index: {}, may-alias: {0,1}]   ;;  %s4082_s1 = inlined_call_operand.vmem [shape: bf16[2,8,1280], index: 1, kind: input, shape index: {}, may-alias: {0,1}]   ;;  %s4083_s2 = inlined_call_operand.vmem [shape: bf16[9,12,8], index: 2, kind: input, shape index: {}]   ;;  %s4084_s3 = inlined_call_operand.vmem [shape: f32[12,1], index: 3, kind: input, shape index: {}]   ;;  %s4085_s4 = inlined_call_operand.vmem [shape: f32[2,12,1152], index: 4, kind: output, shape index: {}]  }
   0x1   :  { %s3434_s17 = smov 0  }
   0x2 LB: > { %s26_s18 = sadd.s32 1, %s3388_s16  ;;  %p3116_p0 = scmp.ge.s32.totalorder %s3392_s17, 1  ;;  %s3392_s17 = sphi %s3434_s17, %s14_s17   ;;  %s3388_s16 = sphi %s3432_s16, %s4119_s16   ;;  %s3384_s15 = sphi %s3430_s15, %s4118_s15  }
   0x3   : > { %p28_p1 = scmp.ge.s32.totalorder %s26_s18, 2  ;;  %p214_p2 = scmp.lt.s32.totalorder %s3392_s17, 3 }
   0x5   : > { %s4121_s18 = smov (%p28_p1, %s26_s18), 0  ;;  %p215_p3 = pnand %p3116_p0, %p214_p2 }
   0x7   : > { %218 = sbr.rel (%p215_p3) target bundleno = 523 (0x20b), region = 36 }
   0xc   : > { %p267_p4 = scmp.lt.s32.totalorder %s3384_s15, 1  ;;  %v3394_v0 = vmov 0   ;;  %s3395_s23 = smov 127   ;;  %vm363_vm0 = vcmask 1039360   ;;  %vm377_vm1 = vcmask 1043456   ;;  %vm373_vm2 = vcmask 64512  }
   0xd   : > { %437 = vmatprep.mubr.bf16.mxu0 %v3394_v0  ;;  %480 = vmatprep.mubr.bf16.mxu1 %v3394_v0  ;;  %s3396_s28 = smov 126   ;;  %s3397_s29 = smov 94   ;;  %v3361_v22 = vld [vmem:[%s4083_s2 + $0x8] sm:$0x3f]   ;;  %v3402_v36 = vmov 0.0   ;;  %vm3403_vm3 = vmmov 0  }
   0xe   : > { %s4123_s15 = smov (!%p267_p4, %s3384_s15), 1  ;;  %3350 = vset.pattern.permute.xlu0 %v3394_v0  ;;  %3351 = vset.pattern.permute.xlu1 %v3394_v0  ;;  %s3398_s30 = smov 93   ;;  %v3362_v47 = vld [vmem:[%s4083_s2] sm:$0x3f]   ;;  %vm894_vm4 = vcmask 1031168   ;;  %vm1193_vm5 = vcmask 769024  }
   0xf   : > { %s3311_s19 = smul.u32 40, %s4123_s15  ;;  %s3399_s5 = smov 92   ;;  %vm1492_vm6 = vcmask 760832   ;;  %vm1791_vm7 = vcmask 752640   ;;  %vm2090_vm8 = vcmask 490496   ;;  %vm2389_vm9 = vcmask 482304  }
  0x10   : > { %s3400_s6 = smov 60   ;;  %s3401_s9 = smov 59   ;;  %vm2688_vm10 = vcmask 474112  }
  0x11   : > { %s274_s22 = scalar_lea.vmem %s4081_s0, %s3311_s19  ;;  %s3238_s24 = sadd.s32 36, %s3311_s19 }
  0x12   : > { %v304_v1 = vld [vmem:[%s274_s22 + $0x8] sm:$0xff]  ;;  %v303_v2 = vld [vmem:[%s274_s22] sm:$0xff]  ;;  %v305_v5 = vld [vmem:[%s274_s22 + $0x10] sm:$0xff]  ;;  %s289_s27 = scalar_lea.vmem %s4082_s1, %s3238_s24  ;;  %s3404_s12 = smov 58  }
  0x13   : > { %v3458_v3 = vcombine.low %v304_v1, %v304_v1  ;;  %v3460_v4 = vcombine.low %v303_v2, %v303_v2  ;;  %v3464_v6 = vcombine.high %v304_v1, %v304_v1  ;;  %v3466_v7 = vcombine.high %v303_v2, %v303_v2  ;;  %v306_v10 = vld [vmem:[%s274_s22 + $0x18] sm:$0xff]  ;;  %v3485_v13 = vld [vmem:[%s274_s22 + $0x20] ss:$0 sps:$4 sm:$0xff]  }
  0x14   : > { %v3470_v8 = vcombine.high %v305_v5, %v305_v5  ;;  %v3472_v9 = vcombine.low %v305_v5, %v305_v5  ;;  %v3476_v11 = vcombine.high %v306_v10, %v306_v10  ;;  %v3478_v12 = vcombine.low %v306_v10, %v306_v10  ;;  %v3487_v14 = vld [vmem:[%s289_s27] sm:$0xf] }
  0x15   : > { %347 = vrot.lane.b32.xlu1 %v3458_v3, %s3395_s23  ;;  %343 = vrot.lane.b32.xlu0 %v3460_v4, %s3395_s23  ;;  %v627_v41 = vsel %vm377_vm1, %v3460_v4, 0  ;;  %v633_v44 = vsel %vm377_vm1, %v3458_v3, 0  ;;  %v651_v55 = vsel %vm377_vm1, %v3485_v13, 0 }
  0x16   : > { %v639_v48 = vsel %vm377_vm1, %v3472_v9, 0  ;;  %v645_v51 = vsel %vm377_vm1, %v3478_v12, 0 }
  0x19   : > { %349 = vrot.lane.b32.xlu1 %v3464_v6, %s3395_s23  ;;  %345 = vrot.lane.b32.xlu0 %v3466_v7, %s3395_s23 }
  0x1d   : > { %353 = vrot.lane.b32.xlu1 %v3470_v8, %s3395_s23  ;;  %351 = vrot.lane.b32.xlu0 %v3472_v9, %s3395_s23 }
  0x21   : > { %357 = vrot.lane.b32.xlu1 %v3476_v11, %s3395_s23  ;;  %355 = vrot.lane.b32.xlu0 %v3478_v12, %s3395_s23 }
  0x25   : > { %359 = vrot.lane.b32.xlu0 %v3485_v13, %s3395_s23  ;;  %361 = vrot.lane.b32.xlu1 %v3487_v14, %s3395_s23 }
  0x29   : > { %874 = vrot.lane.b32.xlu0 %v3460_v4, %s3396_s28  ;;  %876 = vrot.lane.b32.xlu1 %v3466_v7, %s3396_s28 }
  0x2d   : > { %878 = vrot.lane.b32.xlu0 %v3458_v3, %s3396_s28  ;;  %880 = vrot.lane.b32.xlu1 %v3464_v6, %s3396_s28 }
  0x31   : > { %882 = vrot.lane.b32.xlu0 %v3472_v9, %s3396_s28  ;;  %884 = vrot.lane.b32.xlu1 %v3470_v8, %s3396_s28 }
  0x35   : > { %886 = vrot.lane.b32.xlu0 %v3478_v12, %s3396_s28  ;;  %888 = vrot.lane.b32.xlu1 %v3476_v11, %s3396_s28 }
  0x39   : > { %890 = vrot.lane.b32.xlu0 %v3485_v13, %s3396_s28  ;;  %892 = vrot.lane.b32.xlu1 %v3487_v14, %s3396_s28 }
  0x3d   : > { %1173 = vrot.lane.b32.xlu0 %v3460_v4, %s3397_s29  ;;  %1175 = vrot.lane.b32.xlu1 %v3466_v7, %s3397_s29 }
  0x41   : > { %1177 = vrot.lane.b32.xlu0 %v3458_v3, %s3397_s29  ;;  %1179 = vrot.lane.b32.xlu1 %v3464_v6, %s3397_s29 }
  0x45   : > { %1181 = vrot.lane.b32.xlu0 %v3472_v9, %s3397_s29  ;;  %1183 = vrot.lane.b32.xlu1 %v3470_v8, %s3397_s29 }
  0x49   : > { %1185 = vrot.lane.b32.xlu0 %v3478_v12, %s3397_s29  ;;  %1187 = vrot.lane.b32.xlu1 %v3476_v11, %s3397_s29 }
  0x4d   : > { %1189 = vrot.lane.b32.xlu0 %v3485_v13, %s3397_s29  ;;  %1191 = vrot.lane.b32.xlu1 %v3487_v14, %s3397_s29 }
  0x51   : > { %1472 = vrot.lane.b32.xlu0 %v3460_v4, %s3398_s30  ;;  %1474 = vrot.lane.b32.xlu1 %v3466_v7, %s3398_s30 }
  0x55   : > { %1476 = vrot.lane.b32.xlu0 %v3458_v3, %s3398_s30  ;;  %1478 = vrot.lane.b32.xlu1 %v3464_v6, %s3398_s30 }
  0x59   : > { %1480 = vrot.lane.b32.xlu0 %v3472_v9, %s3398_s30  ;;  %1482 = vrot.lane.b32.xlu1 %v3470_v8, %s3398_s30 }
  0x5d   : > { %1484 = vrot.lane.b32.xlu0 %v3478_v12, %s3398_s30  ;;  %1486 = vrot.lane.b32.xlu1 %v3476_v11, %s3398_s30 }
  0x61   : > { %1488 = vrot.lane.b32.xlu0 %v3485_v13, %s3398_s30  ;;  %1490 = vrot.lane.b32.xlu1 %v3487_v14, %s3398_s30 }
  0x65   : > { %1771 = vrot.lane.b32.xlu0 %v3460_v4, %s3399_s5  ;;  %1773 = vrot.lane.b32.xlu1 %v3466_v7, %s3399_s5 }
  0x69   : > { %1775 = vrot.lane.b32.xlu0 %v3458_v3, %s3399_s5  ;;  %1777 = vrot.lane.b32.xlu1 %v3464_v6, %s3399_s5 }
  0x6d   : > { %1779 = vrot.lane.b32.xlu0 %v3472_v9, %s3399_s5  ;;  %1781 = vrot.lane.b32.xlu1 %v3470_v8, %s3399_s5 }
  0x71   : > { %1783 = vrot.lane.b32.xlu0 %v3478_v12, %s3399_s5  ;;  %1785 = vrot.lane.b32.xlu1 %v3476_v11, %s3399_s5 }
  0x75   : > { %1787 = vrot.lane.b32.xlu0 %v3485_v13, %s3399_s5  ;;  %1789 = vrot.lane.b32.xlu1 %v3487_v14, %s3399_s5 }
  0x79   : > { %2070 = vrot.lane.b32.xlu0 %v3460_v4, %s3400_s6  ;;  %2072 = vrot.lane.b32.xlu1 %v3466_v7, %s3400_s6 }
  0x7d   : > { %2074 = vrot.lane.b32.xlu0 %v3458_v3, %s3400_s6  ;;  %2076 = vrot.lane.b32.xlu1 %v3464_v6, %s3400_s6 }
  0x81   : > { %2078 = vrot.lane.b32.xlu0 %v3472_v9, %s3400_s6  ;;  %2080 = vrot.lane.b32.xlu1 %v3470_v8, %s3400_s6 }
  0x85   : > { %2082 = vrot.lane.b32.xlu0 %v3478_v12, %s3400_s6  ;;  %2084 = vrot.lane.b32.xlu1 %v3476_v11, %s3400_s6 }
  0x87   : > { %v348_v15 = vpop.permute.xlu1 %347  ;;  %v344_v16 = vpop.permute.xlu0 %343 }
  0x89   : > { %2086 = vrot.lane.b32.xlu0 %v3485_v13, %s3400_s6  ;;  %2088 = vrot.lane.b32.xlu1 %v3487_v14, %s3400_s6 }
  0x8b   : > { %v350_v17 = vpop.permute.xlu1 %349  ;;  %v346_v18 = vpop.permute.xlu0 %345 }
  0x8c   : > { %v365_v19 = vsel %vm363_vm0, %v346_v18, %v348_v15  ;;  %v364_v20 = vsel %vm363_vm0, %v344_v16, %v346_v18  ;;  %v366_v23 = vsel %vm363_vm0, %v348_v15, %v350_v17 }
  0x8d   : > { %3132 = vmatprep.subr.msk.bf16.mxu0 %vm377_vm1, %v365_v19  ;;  %v379_v21 = vsel %vm377_vm1, %v364_v20, 0  ;;  %2369 = vrot.lane.b32.xlu0 %v3460_v4, %s3401_s9  ;;  %v385_v27 = vsel %vm377_vm1, %v366_v23, 0 }
  0x8e   : > { %420 = vmatpush1.bf16.msra.mxu0 %v379_v21  ;;  %2371 = vrot.lane.b32.xlu1 %v3466_v7, %s3401_s9 }
  0x8f   : > { %v354_v24 = vpop.permute.xlu1 %353  ;;  %v352_v25 = vpop.permute.xlu0 %351 }
  0x90   : > { %v367_v26 = vsel %vm363_vm0, %v350_v17, %v352_v25  ;;  %v368_v28 = vsel %vm363_vm0, %v352_v25, %v354_v24 }
  0x91   : > { %3133 = vmatmul.mubr.msk.bf16.vlgmr.msra.gmra.mxu0 %vm373_vm2, %v3361_v22  ;;  %3134 = vmatprep.subr.msk.bf16.mxu1 %vm377_vm1, %v367_v26  ;;  %v391_v32 = vsel %vm377_vm1, %v368_v28, 0 }
  0x92   : > { %463 = vmatpush1.bf16.msra.mxu1 %v385_v27  ;;  %523 = vmatprep.mubr.bf16.mxu0 %v3394_v0 }
  0x93   : > { %v358_v29 = vpop.permute.xlu1 %357  ;;  %v356_v30 = vpop.permute.xlu0 %355  ;;  %2373 = vrot.lane.b32.xlu0 %v3458_v3, %s3401_s9  ;;  %2375 = vrot.lane.b32.xlu1 %v3464_v6, %s3401_s9 }
  0x94   : > { %v369_v31 = vsel %vm363_vm0, %v354_v24, %v356_v30  ;;  %v370_v33 = vsel %vm363_vm0, %v356_v30, %v358_v29 }
  0x95   : > { %3135 = vmatmul.mubr.msk.bf16.vlgmr.msra.gmra.mxu1 %vm373_vm2, %v3361_v22  ;;  %3136 = vmatprep.subr.msk.bf16.mxu0 %vm377_vm1, %v369_v31  ;;  %v397_v39 = vsel %vm377_vm1, %v370_v33, 0 }
  0x96   : > { %506 = vmatpush1.bf16.msra.mxu0 %v391_v32  ;;  %566 = vmatprep.mubr.bf16.mxu1 %v3394_v0  ;;  %v3364_v32 = vld [vmem:[%s4083_s2 + $0x18] sm:$0x3f]  }
  0x97   : > { %v360_v34 = vpop.permute.xlu0 %359  ;;  %v362_v35 = vpop.permute.xlu1 %361  ;;  %3257 = vmatprep.subr.bf16.mxu0 %v3402_v36  ;;  %2377 = vrot.lane.b32.xlu0 %v3472_v9, %s3401_s9 }
  0x98   : > { %v371_v37 = vsel %vm363_vm0, %v358_v29, %v360_v34  ;;  %v372_v38 = vsel %vm363_vm0, %v360_v34, %v362_v35  ;;  %2379 = vrot.lane.b32.xlu1 %v3470_v8, %s3401_s9 }
  0x99   : > { %v403_v40 = vsel %vm377_vm1, %v372_v38, 0  ;;  %3137 = vmatmul.mubr.msk.bf16.vlgmr.msra.gmra.mxu0 %vm373_vm2, %v3361_v22  ;;  %3138 = vmatprep.subr.msk.bf16.mxu1 %vm377_vm1, %v371_v37 }
  0x9a   : > { %549 = vmatpush1.bf16.msra.mxu1 %v397_v39  ;;  %3258 = vmatpush3.bf16.msra.mxu0 %v403_v40 }
  0x9b   : > { %3259 = vmatprep.mubr.msk.bf16.mxu0 %vm3403_vm3, %v3402_v36  ;;  %3142 = vmatprep.subr.msk.bf16.mxu1 %vm377_vm1, %v3466_v7  ;;  %v875_v42 = vpop.permute.xlu0 %874  ;;  %v877_v43 = vpop.permute.xlu1 %876 }
  0x9c   : > { %3144 = vmatprep.subr.msk.bf16.mxu0 %vm377_vm1, %v3464_v6  ;;  %2381 = vrot.lane.b32.xlu0 %v3478_v12, %s3401_s9  ;;  %v895_v58 = vsel %vm894_vm4, %v875_v42, %v877_v43 }
  0x9d   : > { %3139 = vmatmul.mubr.msk.bf16.vlgmr.msra.gmra.mxu1 %vm373_vm2, %v3361_v22  ;;  %2383 = vrot.lane.b32.xlu1 %v3476_v11, %s3401_s9  ;;  %v908_v60 = vsel %vm377_vm1, %v895_v58, 0  ;;  %v3365_v58 = vld [vmem:[%s4083_s2 + $0x20] sm:$0x3f]  }
  0x9e   : > { %668 = vmatpush1.bf16.msra.mxu1 %v627_v41  ;;  %685 = vmatprep.mubr.bf16.mxu1 %v3394_v0 }
  0x9f   : > { %3146 = vmatprep.subr.msk.bf16.mxu1 %vm377_vm1, %v3470_v8  ;;  %v879_v45 = vpop.permute.xlu0 %878  ;;  %v881_v46 = vpop.permute.xlu1 %880 }
  0xa0   : > { %2385 = vrot.lane.b32.xlu0 %v3485_v13, %s3401_s9  ;;  %v896_v54 = vsel %vm894_vm4, %v877_v43, %v879_v45  ;;  %v897_v63 = vsel %vm894_vm4, %v879_v45, %v881_v46 }
  0xa1   : > { %3260 = vmatmul.mubr.msk.bf16.vlgmr.msra.gmra.mxu0 %vm373_vm2, %v3361_v22  ;;  %2387 = vrot.lane.b32.xlu1 %v3487_v14, %s3401_s9  ;;  %v914_v2 = vsel %vm377_vm1, %v897_v63, 0  ;;  %s3313_s9 = smul.u32 144, %s4123_s15 }
  0xa2   : > { %711 = vmatpush1.bf16.msra.mxu0 %v633_v44  ;;  %728 = vmatprep.mubr.bf16.mxu0 %v3394_v0 }
  0xa3   : > { %3148 = vmatprep.subr.msk.bf16.mxu0 %vm377_vm1, %v3476_v11  ;;  %v883_v49 = vpop.permute.xlu0 %882  ;;  %v885_v50 = vpop.permute.xlu1 %884  ;;  %s4002_s11 = scalar_lea.vmem %s4085_s4, %s3313_s9 }
  0xa4   : > { %2668 = vrot.lane.b32.xlu0 %v3460_v4, %s3404_s12  ;;  %v898_v59 = vsel %vm894_vm4, %v881_v46, %v883_v49  ;;  %v899_v5 = vsel %vm894_vm4, %v883_v49, %v885_v50 }
  0xa5   : > { %3143 = vmatmul.mubr.msk.bf16.vlgmr.msra.gmra.mxu1 %vm373_vm2, %v3362_v47  ;;  %2670 = vrot.lane.b32.xlu1 %v3466_v7, %s3404_s12  ;;  %v3363_v7 = vld [vmem:[%s4083_s2 + $0x10] sm:$0x3f]  }
  0xa6   : > { %754 = vmatpush1.bf16.msra.mxu1 %v639_v48  ;;  %771 = vmatprep.mubr.bf16.mxu1 %v3394_v0 }
  0xa7   : > { %3263 = vmatprep.subr.bf16.mxu1 %v3402_v36  ;;  %v887_v52 = vpop.permute.xlu0 %886  ;;  %v889_v53 = vpop.permute.xlu1 %888 }
  0xa8   : > { %2672 = vrot.lane.b32.xlu0 %v3458_v3, %s3404_s12  ;;  %v900_v1 = vsel %vm894_vm4, %v885_v50, %v887_v52 }
  0xa9   : > { %3145 = vmatmul.mubr.msk.bf16.vlgmr.msra.gmra.mxu0 %vm373_vm2, %v3362_v47  ;;  %2674 = vrot.lane.b32.xlu1 %v3464_v6, %s3404_s12 }
  0xaa   : > { %797 = vmatpush1.bf16.msra.mxu0 %v645_v51  ;;  %814 = vmatprep.mubr.bf16.mxu0 %v3394_v0 }
  0xab   : > { %3154 = vmatprep.subr.msk.bf16.mxu0 %vm377_vm1, %v896_v54  ;;  %v891_v56 = vpop.permute.xlu0 %890  ;;  %v893_v57 = vpop.permute.xlu1 %892 }
  0xac   : > { %2676 = vrot.lane.b32.xlu0 %v3472_v9, %s3404_s12  ;;  %v902_v6 = vsel %vm894_vm4, %v889_v53, %v891_v56  ;;  %v903_v15 = vsel %vm894_vm4, %v891_v56, %v893_v57 }
  0xad   : > { %3147 = vmatmul.mubr.msk.bf16.vlgmr.msra.gmra.mxu1 %vm373_vm2, %v3362_v47  ;;  %2678 = vrot.lane.b32.xlu1 %v3470_v8, %s3404_s12  ;;  %v920_v8 = vsel %vm377_vm1, %v899_v5, 0  ;;  %v932_v17 = vsel %vm377_vm1, %v903_v15, 0 }
  0xae   : > { %3264 = vmatpush3.bf16.msra.mxu1 %v651_v55  ;;  %3265 = vmatprep.mubr.msk.bf16.mxu1 %vm3403_vm3, %v3402_v36 }
  0xaf   : > { %3156 = vmatprep.subr.msk.bf16.mxu1 %vm377_vm1, %v898_v59  ;;  %v1174_v61 = vpop.permute.xlu0 %1173  ;;  %v1176_v62 = vpop.permute.xlu1 %1175 }
  0xb0   : > { %2680 = vrot.lane.b32.xlu0 %v3478_v12, %s3404_s12  ;;  %v1194_v20 = vsel %vm1193_vm5, %v1174_v61, %v1176_v62 }
  0xb1   : > { %3149 = vmatmul.mubr.msk.bf16.vlgmr.msra.gmra.mxu0 %vm373_vm2, %v3362_v47  ;;  %2682 = vrot.lane.b32.xlu1 %v3476_v11, %s3404_s12  ;;  %v901_v11 = vsel %vm894_vm4, %v887_v52, %v889_v53  ;;  %v1207_v22 = vsel %vm377_vm1, %v1194_v20, 0  ;;  %v3366_v20 = vld [vmem:[%s4083_s2 + $0x28] sm:$0x3f]  }
  0xb2   : > { %949 = vmatpush1.bf16.msra.mxu0 %v908_v60  ;;  %966 = vmatprep.mubr.bf16.mxu0 %v3394_v0  ;;  %v926_v12 = vsel %vm377_vm1, %v901_v11, 0 }
  0xb3   : > { %3158 = vmatprep.subr.msk.bf16.mxu0 %vm377_vm1, %v900_v1  ;;  %v1178_v3 = vpop.permute.xlu0 %1177  ;;  %v1180_v4 = vpop.permute.xlu1 %1179 }
  0xb4   : > { %2684 = vrot.lane.b32.xlu0 %v3485_v13, %s3404_s12  ;;  %v1195_v16 = vsel %vm1193_vm5, %v1176_v62, %v1178_v3  ;;  %v1196_v25 = vsel %vm1193_vm5, %v1178_v3, %v1180_v4 }
  0xb5   : > { %3266 = vmatmul.mubr.msk.bf16.vlgmr.msra.gmra.mxu1 %vm373_vm2, %v3362_v47  ;;  %2686 = vrot.lane.b32.xlu1 %v3487_v14, %s3404_s12  ;;  %v1213_v27 = vsel %vm377_vm1, %v1196_v25, 0 }
  0xb6   : > { %992 = vmatpush1.bf16.msra.mxu1 %v914_v2  ;;  %1009 = vmatprep.mubr.bf16.mxu1 %v3394_v0 }
  0xb7   : > { %3160 = vmatprep.subr.msk.bf16.mxu1 %vm377_vm1, %v902_v6  ;;  %v1182_v9 = vpop.permute.xlu0 %1181  ;;  %v1184_v10 = vpop.permute.xlu1 %1183 }
  0xb8   : > { %v1197_v21 = vsel %vm1193_vm5, %v1180_v4, %v1182_v9  ;;  %v1198_v30 = vsel %vm1193_vm5, %v1182_v9, %v1184_v10 }
  0xb9   : > { %3155 = vmatmul.mubr.msk.bf16.vlgmr.msra.gmra.mxu0 %vm373_vm2, %v3363_v7  ;;  %v1219_v33 = vsel %vm377_vm1, %v1198_v30, 0 }
  0xba   : > { %1035 = vmatpush1.bf16.msra.mxu0 %v920_v8  ;;  %1052 = vmatprep.mubr.bf16.mxu0 %v3394_v0 }
  0xbb   : > { %3269 = vmatprep.subr.bf16.mxu0 %v3402_v36  ;;  %v1186_v13 = vpop.permute.xlu0 %1185  ;;  %v1188_v14 = vpop.permute.xlu1 %1187 }
  0xbc   : > { %v1199_v26 = vsel %vm1193_vm5, %v1184_v10, %v1186_v13  ;;  %v1200_v37 = vsel %vm1193_vm5, %v1186_v13, %v1188_v14 }
  0xbd   : > { %3157 = vmatmul.mubr.msk.bf16.vlgmr.msra.gmra.mxu1 %vm373_vm2, %v3363_v7  ;;  %v1225_v38 = vsel %vm377_vm1, %v1200_v37, 0 }
  0xbe   : > { %1078 = vmatpush1.bf16.msra.mxu1 %v926_v12  ;;  %1095 = vmatprep.mubr.bf16.mxu1 %v3394_v0 }
  0xbf   : > { %3166 = vmatprep.subr.msk.bf16.mxu1 %vm377_vm1, %v1195_v16  ;;  %v1190_v18 = vpop.permute.xlu0 %1189  ;;  %v1192_v19 = vpop.permute.xlu1 %1191 }
  0xc0   : > { %v1201_v31 = vsel %vm1193_vm5, %v1188_v14, %v1190_v18  ;;  %v1202_v41 = vsel %vm1193_vm5, %v1190_v18, %v1192_v19 }
  0xc1   : > { %3159 = vmatmul.mubr.msk.bf16.vlgmr.msra.gmra.mxu0 %vm373_vm2, %v3363_v7  ;;  %v1231_v43 = vsel %vm377_vm1, %v1202_v41, 0 }
  0xc2   : > { %3270 = vmatpush3.bf16.msra.mxu0 %v932_v17  ;;  %3271 = vmatprep.mubr.msk.bf16.mxu0 %vm3403_vm3, %v3402_v36 }
  0xc3   : > { %3168 = vmatprep.subr.msk.bf16.mxu0 %vm377_vm1, %v1197_v21  ;;  %v1473_v23 = vpop.permute.xlu0 %1472  ;;  %v1475_v24 = vpop.permute.xlu1 %1474 }
  0xc4   : > { %v1493_v46 = vsel %vm1492_vm6, %v1473_v23, %v1475_v24 }
  0xc5   : > { %3161 = vmatmul.mubr.msk.bf16.vlgmr.msra.gmra.mxu1 %vm373_vm2, %v3363_v7  ;;  %v1506_v48 = vsel %vm377_vm1, %v1493_v46, 0  ;;  %v3367_v46 = vld [vmem:[%s4083_s2 + $0x30] sm:$0x3f]  }
  0xc6   : > { %1248 = vmatpush1.bf16.msra.mxu1 %v1207_v22  ;;  %1265 = vmatprep.mubr.bf16.mxu1 %v3394_v0 }
  0xc7   : > { %3170 = vmatprep.subr.msk.bf16.mxu1 %vm377_vm1, %v1199_v26  ;;  %v1477_v28 = vpop.permute.xlu0 %1476  ;;  %v1479_v29 = vpop.permute.xlu1 %1478 }
  0xc8   : > { %v1494_v42 = vsel %vm1492_vm6, %v1475_v24, %v1477_v28  ;;  %v1495_v51 = vsel %vm1492_vm6, %v1477_v28, %v1479_v29  ;;  %v2959_v28 = vld [vmem:[%s4084_s3] sm:$0xff] }
  0xc9   : > { %3272 = vmatmul.mubr.msk.bf16.vlgmr.msra.gmra.mxu0 %vm373_vm2, %v3363_v7  ;;  %v1512_v53 = vsel %vm377_vm1, %v1495_v51, 0  ;;  %2963 = vperm.xlu0 %3350, %v2959_v28  }
  0xca   : > { %1291 = vmatpush1.bf16.msra.mxu0 %v1213_v27  ;;  %1308 = vmatprep.mubr.bf16.mxu0 %v3394_v0 }
  0xcb   : > { %3172 = vmatprep.subr.msk.bf16.mxu0 %vm377_vm1, %v1201_v31  ;;  %v1481_v34 = vpop.permute.xlu0 %1480  ;;  %v1483_v35 = vpop.permute.xlu1 %1482 }
  0xcc   : > { %v1496_v47 = vsel %vm1492_vm6, %v1479_v29, %v1481_v34  ;;  %v1497_v56 = vsel %vm1492_vm6, %v1481_v34, %v1483_v35  ;;  %v2960_v34 = vld [vmem:[%s4084_s3 + $0x8] sm:$0xf] }
  0xcd   : > { %3167 = vmatmul.mubr.msk.bf16.vlgmr.msra.gmra.mxu1 %vm373_vm2, %v3364_v32  ;;  %v1518_v59 = vsel %vm377_vm1, %v1497_v56, 0  ;;  %2968 = vperm.xlu1 %3351, %v2960_v34  }
  0xce   : > { %1334 = vmatpush1.bf16.msra.mxu1 %v1219_v33  ;;  %1351 = vmatprep.mubr.bf16.mxu1 %v3394_v0 }
  0xcf   : > { %3275 = vmatprep.subr.bf16.mxu1 %v3402_v36  ;;  %v1485_v39 = vpop.permute.xlu0 %1484  ;;  %v1487_v40 = vpop.permute.xlu1 %1486 }
  0xd0   : > { %v1498_v52 = vsel %vm1492_vm6, %v1483_v35, %v1485_v39  ;;  %v1499_v62 = vsel %vm1492_vm6, %v1485_v39, %v1487_v40 }
  0xd1   : > { %3169 = vmatmul.mubr.msk.bf16.vlgmr.msra.gmra.mxu0 %vm373_vm2, %v3364_v32  ;;  %v1524_v63 = vsel %vm377_vm1, %v1499_v62, 0 }
  0xd2   : > { %1377 = vmatpush1.bf16.msra.mxu0 %v1225_v38  ;;  %1394 = vmatprep.mubr.bf16.mxu0 %v3394_v0 }
  0xd3   : > { %3178 = vmatprep.subr.msk.bf16.mxu0 %vm377_vm1, %v1494_v42  ;;  %v1489_v44 = vpop.permute.xlu0 %1488  ;;  %v1491_v45 = vpop.permute.xlu1 %1490 }
  0xd4   : > { %v1500_v57 = vsel %vm1492_vm6, %v1487_v40, %v1489_v44  ;;  %v1501_v3 = vsel %vm1492_vm6, %v1489_v44, %v1491_v45 }
  0xd5   : > { %3171 = vmatmul.mubr.msk.bf16.vlgmr.msra.gmra.mxu1 %vm373_vm2, %v3364_v32  ;;  %v1530_v5 = vsel %vm377_vm1, %v1501_v3, 0 }
  0xd6   : > { %3276 = vmatpush3.bf16.msra.mxu1 %v1231_v43  ;;  %3277 = vmatprep.mubr.msk.bf16.mxu1 %vm3403_vm3, %v3402_v36 }
  0xd7   : > { %3180 = vmatprep.subr.msk.bf16.mxu1 %vm377_vm1, %v1496_v47  ;;  %v1772_v49 = vpop.permute.xlu0 %1771  ;;  %v1774_v50 = vpop.permute.xlu1 %1773 }
  0xd8   : > { %v1792_v8 = vsel %vm1791_vm7, %v1772_v49, %v1774_v50 }
  0xd9   : > { %3173 = vmatmul.mubr.msk.bf16.vlgmr.msra.gmra.mxu0 %vm373_vm2, %v3364_v32  ;;  %v1805_v10 = vsel %vm377_vm1, %v1792_v8, 0  ;;  %v3368_v8 = vld [vmem:[%s4083_s2 + $0x38] sm:$0x3f]  }
  0xda   : > { %1547 = vmatpush1.bf16.msra.mxu0 %v1506_v48  ;;  %1564 = vmatprep.mubr.bf16.mxu0 %v3394_v0 }
  0xdb   : > { %3182 = vmatprep.subr.msk.bf16.mxu0 %vm377_vm1, %v1498_v52  ;;  %v1776_v54 = vpop.permute.xlu0 %1775  ;;  %v1778_v55 = vpop.permute.xlu1 %1777 }
  0xdc   : > { %v1793_v4 = vsel %vm1791_vm7, %v1774_v50, %v1776_v54  ;;  %v1794_v13 = vsel %vm1791_vm7, %v1776_v54, %v1778_v55 }
  0xdd   : > { %3278 = vmatmul.mubr.msk.bf16.vlgmr.msra.gmra.mxu1 %vm373_vm2, %v3364_v32  ;;  %v1811_v15 = vsel %vm377_vm1, %v1794_v13, 0 }
  0xde   : > { %1590 = vmatpush1.bf16.msra.mxu1 %v1512_v53  ;;  %1607 = vmatprep.mubr.bf16.mxu1 %v3394_v0 }
  0xdf   : > { %3184 = vmatprep.subr.msk.bf16.mxu1 %vm377_vm1, %v1500_v57  ;;  %v1780_v60 = vpop.permute.xlu0 %1779  ;;  %v1782_v61 = vpop.permute.xlu1 %1781 }
  0xe0   : > { %v1795_v9 = vsel %vm1791_vm7, %v1778_v55, %v1780_v60  ;;  %v1796_v18 = vsel %vm1791_vm7, %v1780_v60, %v1782_v61 }
  0xe1   : > { %3179 = vmatmul.mubr.msk.bf16.vlgmr.msra.gmra.mxu0 %vm373_vm2, %v3365_v58  ;;  %v1817_v21 = vsel %vm377_vm1, %v1796_v18, 0 }
  0xe2   : > { %1633 = vmatpush1.bf16.msra.mxu0 %v1518_v59  ;;  %1650 = vmatprep.mubr.bf16.mxu0 %v3394_v0 }
  0xe3   : > { %3281 = vmatprep.subr.bf16.mxu0 %v3402_v36  ;;  %v1784_v1 = vpop.permute.xlu0 %1783  ;;  %v1786_v2 = vpop.permute.xlu1 %1785 }
  0xe4   : > { %v1797_v14 = vsel %vm1791_vm7, %v1782_v61, %v1784_v1  ;;  %v1798_v24 = vsel %vm1791_vm7, %v1784_v1, %v1786_v2 }
  0xe5   : > { %3181 = vmatmul.mubr.msk.bf16.vlgmr.msra.gmra.mxu1 %vm373_vm2, %v3365_v58  ;;  %v1823_v25 = vsel %vm377_vm1, %v1798_v24, 0 }
  0xe6   : > { %1676 = vmatpush1.bf16.msra.mxu1 %v1524_v63  ;;  %1693 = vmatprep.mubr.bf16.mxu1 %v3394_v0 }
  0xe7   : > { %3190 = vmatprep.subr.msk.bf16.mxu1 %vm377_vm1, %v1793_v4  ;;  %v1788_v6 = vpop.permute.xlu0 %1787  ;;  %v1790_v7 = vpop.permute.xlu1 %1789 }
  0xe8   : > { %v1799_v19 = vsel %vm1791_vm7, %v1786_v2, %v1788_v6  ;;  %v1800_v29 = vsel %vm1791_vm7, %v1788_v6, %v1790_v7 }
  0xe9   : > { %3183 = vmatmul.mubr.msk.bf16.vlgmr.msra.gmra.mxu0 %vm373_vm2, %v3365_v58  ;;  %v1829_v31 = vsel %vm377_vm1, %v1800_v29, 0 }
  0xea   : > { %3282 = vmatpush3.bf16.msra.mxu0 %v1530_v5  ;;  %3283 = vmatprep.mubr.msk.bf16.mxu0 %vm3403_vm3, %v3402_v36 }
  0xeb   : > { %3192 = vmatprep.subr.msk.bf16.mxu0 %vm377_vm1, %v1795_v9  ;;  %v2071_v11 = vpop.permute.xlu0 %2070  ;;  %v2073_v12 = vpop.permute.xlu1 %2072 }
  0xec   : > { %v2091_v35 = vsel %vm2090_vm8, %v2071_v11, %v2073_v12 }
  0xed   : > { %3185 = vmatmul.mubr.msk.bf16.vlgmr.msra.gmra.mxu1 %vm373_vm2, %v3365_v58  ;;  %v2104_v38 = vsel %vm377_vm1, %v2091_v35, 0 }
  0xee   : > { %1846 = vmatpush1.bf16.msra.mxu1 %v1805_v10  ;;  %1863 = vmatprep.mubr.bf16.mxu1 %v3394_v0 }
  0xef   : > { %3194 = vmatprep.subr.msk.bf16.mxu1 %vm377_vm1, %v1797_v14  ;;  %v2075_v16 = vpop.permute.xlu0 %2074  ;;  %v2077_v17 = vpop.permute.xlu1 %2076 }
  0xf0   : > { %v2092_v30 = vsel %vm2090_vm8, %v2073_v12, %v2075_v16  ;;  %v2093_v40 = vsel %vm2090_vm8, %v2075_v16, %v2077_v17 }
  0xf1   : > { %3284 = vmatmul.mubr.msk.bf16.vlgmr.msra.gmra.mxu0 %vm373_vm2, %v3365_v58  ;;  %v2110_v43 = vsel %vm377_vm1, %v2093_v40, 0 }
  0xf2   : > { %1889 = vmatpush1.bf16.msra.mxu0 %v1811_v15  ;;  %1906 = vmatprep.mubr.bf16.mxu0 %v3394_v0 }
  0xf3   : > { %3196 = vmatprep.subr.msk.bf16.mxu0 %vm377_vm1, %v1799_v19  ;;  %v2079_v22 = vpop.permute.xlu0 %2078  ;;  %v2081_v23 = vpop.permute.xlu1 %2080 }
  0xf4   : > { %v2094_v37 = vsel %vm2090_vm8, %v2077_v17, %v2079_v22  ;;  %v2095_v44 = vsel %vm2090_vm8, %v2079_v22, %v2081_v23 }
  0xf5   : > { %3191 = vmatmul.mubr.msk.bf16.vlgmr.msra.gmra.mxu1 %vm373_vm2, %v3366_v20  ;;  %v2116_v49 = vsel %vm377_vm1, %v2095_v44, 0 }
  0xf6   : > { %1932 = vmatpush1.bf16.msra.mxu1 %v1817_v21  ;;  %1949 = vmatprep.mubr.bf16.mxu1 %v3394_v0 }
  0xf7   : > { %3287 = vmatprep.subr.bf16.mxu1 %v3402_v36  ;;  %v2083_v26 = vpop.permute.xlu0 %2082  ;;  %v2085_v27 = vpop.permute.xlu1 %2084 }
  0xf8   : > { %v2096_v41 = vsel %vm2090_vm8, %v2081_v23, %v2083_v26  ;;  %v2097_v50 = vsel %vm2090_vm8, %v2083_v26, %v2085_v27 }
  0xf9   : > { %3193 = vmatmul.mubr.msk.bf16.vlgmr.msra.gmra.mxu0 %vm373_vm2, %v3366_v20  ;;  %v2122_v53 = vsel %vm377_vm1, %v2097_v50, 0 }
  0xfa   : > { %1975 = vmatpush1.bf16.msra.mxu0 %v1823_v25  ;;  %1992 = vmatprep.mubr.bf16.mxu0 %v3394_v0 }
  0xfb   : > { %3202 = vmatprep.subr.msk.bf16.mxu0 %vm377_vm1, %v2092_v30  ;;  %v2087_v32 = vpop.permute.xlu0 %2086  ;;  %v2089_v33 = vpop.permute.xlu1 %2088  ;;  %v3369_v30 = vld [vmem:[%s4083_s2 + $0x40] sm:$0x3f]  }
  0xfc   : > { %v2098_v45 = vsel %vm2090_vm8, %v2085_v27, %v2087_v32  ;;  %v2099_v54 = vsel %vm2090_vm8, %v2087_v32, %v2089_v33 }
  0xfd   : > { %3195 = vmatmul.mubr.msk.bf16.vlgmr.msra.gmra.mxu1 %vm373_vm2, %v3366_v20  ;;  %v2128_v57 = vsel %vm377_vm1, %v2099_v54, 0 }
  0xfe   : > { %3288 = vmatpush3.bf16.msra.mxu1 %v1829_v31  ;;  %3289 = vmatprep.mubr.msk.bf16.mxu1 %vm3403_vm3, %v3402_v36 }
  0xff   : > { %3204 = vmatprep.subr.msk.bf16.mxu1 %vm377_vm1, %v2094_v37  ;;  %v2370_v39 = vpop.permute.xlu0 %2369 }
 0x100   : > { %v2372_v42 = vpop.permute.xlu1 %2371 }
 0x101   : > { %3197 = vmatmul.mubr.msk.bf16.vlgmr.msra.gmra.mxu0 %vm373_vm2, %v3366_v20  ;;  %v2390_v59 = vsel %vm2389_vm9, %v2370_v39, %v2372_v42 }
 0x102   : > { %2145 = vmatpush1.bf16.msra.mxu0 %v2104_v38  ;;  %2162 = vmatprep.mubr.bf16.mxu0 %v3394_v0  ;;  %v2403_v62 = vsel %vm377_vm1, %v2390_v59, 0 }
 0x103   : > { %3206 = vmatprep.subr.msk.bf16.mxu0 %vm377_vm1, %v2096_v41 }
 0x105   : > { %3290 = vmatmul.mubr.msk.bf16.vlgmr.msra.gmra.mxu1 %vm373_vm2, %v3366_v20  ;;  %v2374_v47 = vpop.permute.xlu0 %2373  ;;  %v2376_v48 = vpop.permute.xlu1 %2375 }
 0x106   : > { %2188 = vmatpush1.bf16.msra.mxu1 %v2110_v43  ;;  %2205 = vmatprep.mubr.bf16.mxu1 %v3394_v0  ;;  %v2391_v55 = vsel %vm2389_vm9, %v2372_v42, %v2374_v47  ;;  %v2392_v1 = vsel %vm2389_vm9, %v2374_v47, %v2376_v48 }
 0x107   : > { %3208 = vmatprep.subr.msk.bf16.mxu1 %vm377_vm1, %v2098_v45  ;;  %v2409_v4 = vsel %vm377_vm1, %v2392_v1, 0 }
 0x109   : > { %3203 = vmatmul.mubr.msk.bf16.vlgmr.msra.gmra.mxu0 %vm373_vm2, %v3367_v46  ;;  %v2378_v51 = vpop.permute.xlu0 %2377 }
 0x10a   : > { %2231 = vmatpush1.bf16.msra.mxu0 %v2116_v49  ;;  %2248 = vmatprep.mubr.bf16.mxu0 %v3394_v0  ;;  %v2380_v52 = vpop.permute.xlu1 %2379  ;;  %v2393_v60 = vsel %vm2389_vm9, %v2376_v48, %v2378_v51 }
 0x10b   : > { %3293 = vmatprep.subr.bf16.mxu0 %v3402_v36  ;;  %v2394_v6 = vsel %vm2389_vm9, %v2378_v51, %v2380_v52 }
 0x10c   : > { %v2415_v10 = vsel %vm377_vm1, %v2394_v6, 0 }
 0x10d   : > { %3205 = vmatmul.mubr.msk.bf16.vlgmr.msra.gmra.mxu1 %vm373_vm2, %v3367_v46 }
 0x10e   : > { %2274 = vmatpush1.bf16.msra.mxu1 %v2122_v53  ;;  %2291 = vmatprep.mubr.bf16.mxu1 %v3394_v0  ;;  %v2382_v56 = vpop.permute.xlu0 %2381 }
 0x10f   : > { %3214 = vmatprep.subr.msk.bf16.mxu1 %vm377_vm1, %v2391_v55  ;;  %v2384_v58 = vpop.permute.xlu1 %2383  ;;  %v2395_v2 = vsel %vm2389_vm9, %v2380_v52, %v2382_v56 }
 0x110   : > { %v2396_v11 = vsel %vm2389_vm9, %v2382_v56, %v2384_v58 }
 0x111   : > { %3207 = vmatmul.mubr.msk.bf16.vlgmr.msra.gmra.mxu0 %vm373_vm2, %v3367_v46  ;;  %v2421_v14 = vsel %vm377_vm1, %v2396_v11, 0 }
 0x112   : > { %3294 = vmatpush3.bf16.msra.mxu0 %v2128_v57  ;;  %3295 = vmatprep.mubr.msk.bf16.mxu0 %vm3403_vm3, %v3402_v36  ;;  %v2386_v61 = vpop.permute.xlu0 %2385 }
 0x113   : > { %3216 = vmatprep.subr.msk.bf16.mxu0 %vm377_vm1, %v2393_v60  ;;  %v2388_v63 = vpop.permute.xlu1 %2387  ;;  %v2397_v7 = vsel %vm2389_vm9, %v2384_v58, %v2386_v61 }
 0x114   : > { %v2398_v15 = vsel %vm2389_vm9, %v2386_v61, %v2388_v63 }
 0x115   : > { %3209 = vmatmul.mubr.msk.bf16.vlgmr.msra.gmra.mxu1 %vm373_vm2, %v3367_v46  ;;  %v2427_v17 = vsel %vm377_vm1, %v2398_v15, 0 }
 0x116   : > { %2444 = vmatpush1.bf16.msra.mxu1 %v2403_v62  ;;  %2461 = vmatprep.mubr.bf16.mxu1 %v3394_v0  ;;  %v2669_v3 = vpop.permute.xlu0 %2668 }
 0x117   : > { %3218 = vmatprep.subr.msk.bf16.mxu1 %vm377_vm1, %v2395_v2  ;;  %v2671_v5 = vpop.permute.xlu1 %2670 }
 0x118   : > { %v2689_v20 = vsel %vm2688_vm10, %v2669_v3, %v2671_v5 }
 0x119   : > { %3296 = vmatmul.mubr.msk.bf16.vlgmr.msra.gmra.mxu0 %vm373_vm2, %v3367_v46  ;;  %v2702_v22 = vsel %vm377_vm1, %v2689_v20, 0 }
 0x11a   : > { %2487 = vmatpush1.bf16.msra.mxu0 %v2409_v4  ;;  %2504 = vmatprep.mubr.bf16.mxu0 %v3394_v0  ;;  %v2673_v9 = vpop.permute.xlu0 %2672 }
 0x11b   : > { %3220 = vmatprep.subr.msk.bf16.mxu0 %vm377_vm1, %v2397_v7  ;;  %v2675_v12 = vpop.permute.xlu1 %2674  ;;  %v2690_v16 = vsel %vm2688_vm10, %v2671_v5, %v2673_v9 }
 0x11c   : > { %v2691_v23 = vsel %vm2688_vm10, %v2673_v9, %v2675_v12 }
 0x11d   : > { %3215 = vmatmul.mubr.msk.bf16.vlgmr.msra.gmra.mxu1 %vm373_vm2, %v3368_v8  ;;  %v2708_v27 = vsel %vm377_vm1, %v2691_v23, 0 }
 0x11e   : > { %2530 = vmatpush1.bf16.msra.mxu1 %v2415_v10  ;;  %2547 = vmatprep.mubr.bf16.mxu1 %v3394_v0  ;;  %v2677_v13 = vpop.permute.xlu0 %2676 }
 0x11f   : > { %3299 = vmatprep.subr.bf16.mxu1 %v3402_v36  ;;  %v2679_v18 = vpop.permute.xlu1 %2678  ;;  %v2692_v21 = vsel %vm2688_vm10, %v2675_v12, %v2677_v13 }
 0x120   : > { %v2693_v28 = vsel %vm2688_vm10, %v2677_v13, %v2679_v18 }
 0x121   : > { %3217 = vmatmul.mubr.msk.bf16.vlgmr.msra.gmra.mxu0 %vm373_vm2, %v3368_v8  ;;  %v2714_v31 = vsel %vm377_vm1, %v2693_v28, 0 }
 0x122   : > { %2573 = vmatpush1.bf16.msra.mxu0 %v2421_v14  ;;  %2590 = vmatprep.mubr.bf16.mxu0 %v3394_v0  ;;  %v2681_v19 = vpop.permute.xlu0 %2680 }
 0x123   : > { %3226 = vmatprep.subr.msk.bf16.mxu0 %vm377_vm1, %v2690_v16  ;;  %v2694_v24 = vsel %vm2688_vm10, %v2679_v18, %v2681_v19  ;;  %v2683_v25 = vpop.permute.xlu1 %2682 }
 0x124   : > { %v2695_v32 = vsel %vm2688_vm10, %v2681_v19, %v2683_v25 }
 0x125   : > { %3219 = vmatmul.mubr.msk.bf16.vlgmr.msra.gmra.mxu1 %vm373_vm2, %v3368_v8  ;;  %v2720_v34 = vsel %vm377_vm1, %v2695_v32, 0 }
 0x126   : > { %3300 = vmatpush3.bf16.msra.mxu1 %v2427_v17  ;;  %3301 = vmatprep.mubr.msk.bf16.mxu1 %vm3403_vm3, %v3402_v36  ;;  %v2685_v26 = vpop.permute.xlu0 %2684 }
 0x127   : > { %3228 = vmatprep.subr.msk.bf16.mxu1 %vm377_vm1, %v2692_v21  ;;  %v2696_v29 = vsel %vm2688_vm10, %v2683_v25, %v2685_v26  ;;  %v2687_v33 = vpop.permute.xlu1 %2686 }
 0x128   : > { %v2697_v35 = vsel %vm2688_vm10, %v2685_v26, %v2687_v33 }
 0x129   : > { %3221 = vmatmul.mubr.msk.bf16.vlgmr.msra.gmra.mxu0 %vm373_vm2, %v3368_v8  ;;  %v2726_v37 = vsel %vm377_vm1, %v2697_v35, 0 }
 0x12a   : > { %2743 = vmatpush1.bf16.msra.mxu0 %v2702_v22  ;;  %2760 = vmatprep.mubr.bf16.mxu0 %v3394_v0 }
 0x12b   : > { %3230 = vmatprep.subr.msk.bf16.mxu0 %vm377_vm1, %v2694_v24 }
 0x12d   : > { %3302 = vmatmul.mubr.msk.bf16.vlgmr.msra.gmra.mxu1 %vm373_vm2, %v3368_v8 }
 0x12e   : > { %2786 = vmatpush1.bf16.msra.mxu1 %v2708_v27  ;;  %2803 = vmatprep.mubr.bf16.mxu1 %v3394_v0 }
 0x12f   : > { %3232 = vmatprep.subr.msk.bf16.mxu1 %vm377_vm1, %v2696_v29 }
 0x131   : > { %3227 = vmatmul.mubr.msk.bf16.vlgmr.msra.gmra.mxu0 %vm373_vm2, %v3369_v30 }
 0x132   : > { %2829 = vmatpush1.bf16.msra.mxu0 %v2714_v31  ;;  %2846 = vmatprep.mubr.bf16.mxu0 %v3394_v0 }
 0x133   : > { %3305 = vmatprep.subr.bf16.mxu0 %v3402_v36 }
 0x135   : > { %3229 = vmatmul.mubr.msk.bf16.vlgmr.msra.gmra.mxu1 %vm373_vm2, %v3369_v30 }
 0x136   : > { %2872 = vmatpush1.bf16.msra.mxu1 %v2720_v34  ;;  %2889 = vmatprep.mubr.bf16.mxu1 %v3394_v0 }
 0x139   : > { %3231 = vmatmul.mubr.msk.bf16.vlgmr.msra.gmra.mxu0 %vm373_vm2, %v3369_v30 }
 0x13a   : > { %3306 = vmatpush3.bf16.msra.mxu0 %v2726_v37  ;;  %3307 = vmatprep.mubr.msk.bf16.mxu0 %vm3403_vm3, %v3402_v36 }
 0x13d   : > { %3233 = vmatmul.mubr.msk.bf16.vlgmr.msra.gmra.mxu1 %vm373_vm2, %v3369_v30 }
 0x141   : > { %3308 = vmatmul.mubr.msk.bf16.vlgmr.msra.gmra.mxu0 %vm373_vm2, %v3369_v30 }
 0x151   : > { %v439_v38 = vpop.f32.mrf.mxu0 }
 0x153   : > { %v441_v39 = vpop.f32.mrf.mxu0 }
 0x155   : > { %v443_v40 = vpop.f32.mrf.mxu0  ;;  %v482_v41 = vpop.f32.mrf.mxu1 }
 0x157   : > { %v445_v42 = vpop.f32.mrf.mxu0  ;;  %v484_v43 = vpop.f32.mrf.mxu1 }
 0x159   : > { %v486_v44 = vpop.f32.mrf.mxu1  ;;  %v525_v0 = vpop.f32.mrf.mxu0 }
 0x15b   : > { %v488_v45 = vpop.f32.mrf.mxu1  ;;  %v527_v46 = vpop.f32.mrf.mxu0 }
 0x15d   : > { %v529_v47 = vpop.f32.mrf.mxu0  ;;  %v568_v48 = vpop.f32.mrf.mxu1 }
 0x15f   : > { %v531_v49 = vpop.f32.mrf.mxu0  ;;  %v570_v50 = vpop.f32.mrf.mxu1 }
 0x161   : > { %v572_v51 = vpop.f32.mrf.mxu1  ;;  %v611_v36 = vpop.f32.mrf.mxu0 }
 0x163   : > { %v574_v52 = vpop.f32.mrf.mxu1  ;;  %v3261_v53 = vpop.f32.mrf.mxu0 }
 0x165   : > { %v614_v54 = vpop.f32.mrf.mxu0  ;;  %v687_v55 = vpop.f32.mrf.mxu1 }
 0x166   : > { %v688_v56 = vadd.f32 %v687_v55, %v439_v38 }
 0x167   : > { %v3262_v57 = vpop.f32.mrf.mxu0  ;;  %v689_v58 = vpop.f32.mrf.mxu1 }
 0x168   : > { %v690_v59 = vadd.f32 %v689_v58, %v441_v39 }
 0x169   : > { %v691_v60 = vpop.f32.mrf.mxu1  ;;  %v730_v61 = vpop.f32.mrf.mxu0 }
 0x16a   : > { %v692_v62 = vadd.f32 %v691_v60, %v443_v40  ;;  %v731_v63 = vadd.f32 %v730_v61, %v482_v41 }
 0x16b   : > { %v693_v1 = vpop.f32.mrf.mxu1  ;;  %v732_v2 = vpop.f32.mrf.mxu0 }
 0x16c   : > { %v694_v3 = vadd.f32 %v693_v1, %v445_v42  ;;  %v733_v4 = vadd.f32 %v732_v2, %v484_v43 }
 0x16d   : > { %v734_v5 = vpop.f32.mrf.mxu0  ;;  %v773_v6 = vpop.f32.mrf.mxu1 }
 0x16e   : > { %v735_v7 = vadd.f32 %v734_v5, %v486_v44  ;;  %v774_v8 = vadd.f32 %v773_v6, %v525_v0 }
 0x16f   : > { %v736_v9 = vpop.f32.mrf.mxu0  ;;  %v775_v10 = vpop.f32.mrf.mxu1 }
 0x170   : > { %v737_v11 = vadd.f32 %v736_v9, %v488_v45  ;;  %v776_v12 = vadd.f32 %v775_v10, %v527_v46 }
 0x171   : > { %v777_v13 = vpop.f32.mrf.mxu1  ;;  %v816_v14 = vpop.f32.mrf.mxu0 }
 0x172   : > { %v778_v15 = vadd.f32 %v777_v13, %v529_v47  ;;  %v817_v16 = vadd.f32 %v816_v14, %v568_v48 }
 0x173   : > { %v779_v17 = vpop.f32.mrf.mxu1  ;;  %v818_v18 = vpop.f32.mrf.mxu0 }
 0x174   : > { %v780_v19 = vadd.f32 %v779_v17, %v531_v49  ;;  %v819_v20 = vadd.f32 %v818_v18, %v570_v50 }
 0x175   : > { %v820_v21 = vpop.f32.mrf.mxu0  ;;  %v859_v22 = vpop.f32.mrf.mxu1 }
 0x176   : > { %v821_v23 = vadd.f32 %v820_v21, %v572_v51  ;;  %v860_v24 = vadd.f32 %v859_v22, %v611_v36 }
 0x177   : > { %v822_v25 = vpop.f32.mrf.mxu0  ;;  %v3267_v26 = vpop.f32.mrf.mxu1 }
 0x178   : > { %v823_v27 = vadd.f32 %v822_v25, %v574_v52 }
 0x179   : > { %v862_v28 = vpop.f32.mrf.mxu1  ;;  %v968_v29 = vpop.f32.mrf.mxu0 }
 0x17a   : > { %v863_v30 = vadd.f32 %v862_v28, %v614_v54  ;;  %v1147_v31 = vadd.f32 %v968_v29, %v688_v56 }
 0x17b   : > { %v3268_v32 = vpop.f32.mrf.mxu1  ;;  %v970_v33 = vpop.f32.mrf.mxu0 }
 0x17c   : > { %v1148_v34 = vadd.f32 %v970_v33, %v690_v59 }
 0x17d   : > { %v972_v35 = vpop.f32.mrf.mxu0  ;;  %v1011_v37 = vpop.f32.mrf.mxu1 }
 0x17e   : > { %v1156_v38 = vadd.f32 %v972_v35, %v692_v62  ;;  %v1149_v39 = vadd.f32 %v1011_v37, %v731_v63 }
 0x17f   : > { %v974_v40 = vpop.f32.mrf.mxu0  ;;  %v1013_v41 = vpop.f32.mrf.mxu1 }
 0x180   : > { %v1157_v42 = vadd.f32 %v974_v40, %v694_v3  ;;  %v1150_v43 = vadd.f32 %v1013_v41, %v733_v4 }
 0x181   : > { %v1015_v44 = vpop.f32.mrf.mxu1  ;;  %v1054_v0 = vpop.f32.mrf.mxu0 }
 0x182   : > { %v1158_v45 = vadd.f32 %v1015_v44, %v735_v7  ;;  %v1151_v46 = vadd.f32 %v1054_v0, %v774_v8 }
 0x183   : > { %v1017_v47 = vpop.f32.mrf.mxu1  ;;  %v1056_v48 = vpop.f32.mrf.mxu0 }
 0x184   : > { %v1159_v49 = vadd.f32 %v1017_v47, %v737_v11  ;;  %v1152_v50 = vadd.f32 %v1056_v48, %v776_v12 }
 0x185   : > { %v1058_v51 = vpop.f32.mrf.mxu0  ;;  %v1097_v36 = vpop.f32.mrf.mxu1 }
 0x186   : > { %v1160_v52 = vadd.f32 %v1058_v51, %v778_v15  ;;  %v1153_v53 = vadd.f32 %v1097_v36, %v817_v16 }
 0x187   : > { %v1060_v54 = vpop.f32.mrf.mxu0  ;;  %v1099_v55 = vpop.f32.mrf.mxu1 }
 0x188   : > { %v1161_v56 = vadd.f32 %v1060_v54, %v780_v19  ;;  %v1154_v57 = vadd.f32 %v1099_v55, %v819_v20 }
 0x189   : > { %v1101_v58 = vpop.f32.mrf.mxu1  ;;  %v1140_v59 = vpop.f32.mrf.mxu0 }
 0x18a   : > { %v1162_v60 = vadd.f32 %v1101_v58, %v821_v23  ;;  %v1155_v61 = vadd.f32 %v1140_v59, %v860_v24 }
 0x18b   : > { %v1103_v62 = vpop.f32.mrf.mxu1  ;;  %v3273_v63 = vpop.f32.mrf.mxu0 }
 0x18c   : > { %v1163_v1 = vadd.f32 %v1103_v62, %v823_v27 }
 0x18d   : > { %v1143_v2 = vpop.f32.mrf.mxu0  ;;  %v1267_v3 = vpop.f32.mrf.mxu1 }
 0x18e   : > { %v1164_v4 = vadd.f32 %v1143_v2, %v863_v30  ;;  %v1446_v5 = vadd.f32 %v1267_v3, %v1147_v31 }
 0x18f   : > { %v3274_v6 = vpop.f32.mrf.mxu0  ;;  %v1269_v7 = vpop.f32.mrf.mxu1 }
 0x190   : > { %v1447_v8 = vadd.f32 %v1269_v7, %v1148_v34 }
 0x191   : > { %v1271_v9 = vpop.f32.mrf.mxu1  ;;  %v1310_v10 = vpop.f32.mrf.mxu0 }
 0x192   : > { %v1455_v11 = vadd.f32 %v1271_v9, %v1156_v38  ;;  %v1448_v12 = vadd.f32 %v1310_v10, %v1149_v39 }
 0x193   : > { %v1273_v13 = vpop.f32.mrf.mxu1  ;;  %v1312_v14 = vpop.f32.mrf.mxu0 }
 0x194   : > { %v1456_v15 = vadd.f32 %v1273_v13, %v1157_v42  ;;  %v1449_v16 = vadd.f32 %v1312_v14, %v1150_v43 }
 0x195   : > { %v1314_v17 = vpop.f32.mrf.mxu0  ;;  %v1353_v18 = vpop.f32.mrf.mxu1 }
 0x196   : > { %v1457_v19 = vadd.f32 %v1314_v17, %v1158_v45  ;;  %v1450_v20 = vadd.f32 %v1353_v18, %v1151_v46 }
 0x197   : > { %v1316_v21 = vpop.f32.mrf.mxu0  ;;  %v1355_v22 = vpop.f32.mrf.mxu1 }
 0x198   : > { %v1458_v23 = vadd.f32 %v1316_v21, %v1159_v49  ;;  %v1451_v24 = vadd.f32 %v1355_v22, %v1152_v50 }
 0x199   : > { %v1357_v25 = vpop.f32.mrf.mxu1  ;;  %v1396_v26 = vpop.f32.mrf.mxu0 }
 0x19a   : > { %v1459_v27 = vadd.f32 %v1357_v25, %v1160_v52  ;;  %v1452_v28 = vadd.f32 %v1396_v26, %v1153_v53 }
 0x19b   : > { %v1359_v29 = vpop.f32.mrf.mxu1  ;;  %v1398_v30 = vpop.f32.mrf.mxu0 }
 0x19c   : > { %v1460_v31 = vadd.f32 %v1359_v29, %v1161_v56  ;;  %v1453_v32 = vadd.f32 %v1398_v30, %v1154_v57 }
 0x19d   : > { %v1400_v33 = vpop.f32.mrf.mxu0  ;;  %v1439_v34 = vpop.f32.mrf.mxu1 }
 0x19e   : > { %v1461_v35 = vadd.f32 %v1400_v33, %v1162_v60  ;;  %v1454_v37 = vadd.f32 %v1439_v34, %v1155_v61 }
 0x19f   : > { %v1402_v38 = vpop.f32.mrf.mxu0  ;;  %v3279_v39 = vpop.f32.mrf.mxu1 }
 0x1a0   : > { %v1462_v40 = vadd.f32 %v1402_v38, %v1163_v1 }
 0x1a1   : > { %v1442_v41 = vpop.f32.mrf.mxu1  ;;  %v1566_v42 = vpop.f32.mrf.mxu0 }
 0x1a2   : > { %v1463_v43 = vadd.f32 %v1442_v41, %v1164_v4  ;;  %v3882_v44 = vadd.f32 %v1566_v42, %v1446_v5 }
 0x1a3   : > { %v3280_v0 = vpop.f32.mrf.mxu1  ;;  %v1568_v45 = vpop.f32.mrf.mxu0 }
 0x1a4   : > { %v3884_v46 = vadd.f32 %v1568_v45, %v1447_v8 }
 0x1a5   : > { %v1570_v47 = vpop.f32.mrf.mxu0  ;;  %v1609_v48 = vpop.f32.mrf.mxu1 }
 0x1a6   : > { %v3886_v49 = vadd.f32 %v1570_v47, %v1455_v11  ;;  %v3888_v50 = vadd.f32 %v1609_v48, %v1448_v12 }
 0x1a7   : > { %v1572_v51 = vpop.f32.mrf.mxu0  ;;  %v1611_v36 = vpop.f32.mrf.mxu1 }
 0x1a8   : > { %v3890_v52 = vadd.f32 %v1572_v51, %v1456_v15  ;;  %v3892_v53 = vadd.f32 %v1611_v36, %v1449_v16 }
 0x1a9   : > { %v1613_v54 = vpop.f32.mrf.mxu1  ;;  %v1652_v55 = vpop.f32.mrf.mxu0 }
 0x1aa   : > { %v3894_v56 = vadd.f32 %v1613_v54, %v1457_v19  ;;  %v3896_v57 = vadd.f32 %v1652_v55, %v1450_v20 }
 0x1ab   : > { %v1615_v58 = vpop.f32.mrf.mxu1  ;;  %v1654_v59 = vpop.f32.mrf.mxu0 }
 0x1ac   : > { %v3898_v60 = vadd.f32 %v1615_v58, %v1458_v23  ;;  %v3900_v61 = vadd.f32 %v1654_v59, %v1451_v24 }
 0x1ad   : > { %v1656_v62 = vpop.f32.mrf.mxu0  ;;  %v1695_v63 = vpop.f32.mrf.mxu1 }
 0x1ae   : > { %v3902_v1 = vadd.f32 %v1656_v62, %v1459_v27  ;;  %v3904_v2 = vadd.f32 %v1695_v63, %v1452_v28 }
 0x1af   : > { %v1658_v3 = vpop.f32.mrf.mxu0  ;;  %v1697_v4 = vpop.f32.mrf.mxu1 }
 0x1b0   : > { %v3906_v5 = vadd.f32 %v1658_v3, %v1460_v31  ;;  %v3908_v6 = vadd.f32 %v1697_v4, %v1453_v32 }
 0x1b1   : > { %v1699_v7 = vpop.f32.mrf.mxu1  ;;  %v1738_v8 = vpop.f32.mrf.mxu0 }
 0x1b2   : > { %v3910_v9 = vadd.f32 %v1699_v7, %v1461_v35  ;;  %v3912_v10 = vadd.f32 %v1738_v8, %v1454_v37 }
 0x1b3   : > { %v1701_v11 = vpop.f32.mrf.mxu1  ;;  %v3285_v12 = vpop.f32.mrf.mxu0 }
 0x1b4   : > { %v3914_v13 = vadd.f32 %v1701_v11, %v1462_v40 }
 0x1b5   : > { %v1741_v14 = vpop.f32.mrf.mxu0  ;;  %v1865_v15 = vpop.f32.mrf.mxu1 }
 0x1b6   : > { %v3916_v16 = vadd.f32 %v1741_v14, %v1463_v43 }
 0x1b7   : > { %v3286_v17 = vpop.f32.mrf.mxu0  ;;  %v1867_v18 = vpop.f32.mrf.mxu1 }
 0x1b8   : > { %4086 = vst [vmem:[#allocation2_spill] sm:$0xff] %v3916_v16 }
 0x1b9   : > { %v1869_v19 = vpop.f32.mrf.mxu1  ;;  %v1908_v20 = vpop.f32.mrf.mxu0 }
 0x1bb   : > { %v1871_v21 = vpop.f32.mrf.mxu1  ;;  %v1910_v22 = vpop.f32.mrf.mxu0 }
 0x1bd   : > { %v1912_v23 = vpop.f32.mrf.mxu0  ;;  %v1951_v24 = vpop.f32.mrf.mxu1 }
 0x1bf   : > { %v1914_v25 = vpop.f32.mrf.mxu0  ;;  %v1953_v26 = vpop.f32.mrf.mxu1 }
 0x1c1   : > { %v3918_v27 = vpop.f32.mrf.mxu1  ;;  %v3920_v28 = vpop.f32.mrf.mxu0 }
 0x1c3   : > { %v3922_v29 = vpop.f32.mrf.mxu1  ;;  %v3924_v30 = vpop.f32.mrf.mxu0 }
 0x1c5   : > { %v3926_v31 = vpop.f32.mrf.mxu0  ;;  %v3928_v32 = vpop.f32.mrf.mxu1 }
 0x1c7   : > { %v3930_v33 = vpop.f32.mrf.mxu0  ;;  %v3291_v34 = vpop.f32.mrf.mxu1 }
 0x1c9   : > { %v3932_v35 = vpop.f32.mrf.mxu1  ;;  %v2164_v37 = vpop.f32.mrf.mxu0 }
 0x1ca   : > { %4087 = vst [vmem:[#allocation3_spill] sm:$0xff] %v3932_v35 }
 0x1cb   : > { %v3292_v38 = vpop.f32.mrf.mxu1  ;;  %v2166_v39 = vpop.f32.mrf.mxu0 }
 0x1cd   : > { %v2168_v40 = vpop.f32.mrf.mxu0  ;;  %v2207_v41 = vpop.f32.mrf.mxu1 }
 0x1cf   : > { %v2170_v42 = vpop.f32.mrf.mxu0  ;;  %v2209_v43 = vpop.f32.mrf.mxu1 }
 0x1d1   : > { %v3934_v0 = vpop.f32.mrf.mxu1  ;;  %v3936_v45 = vpop.f32.mrf.mxu0 }
 0x1d3   : > { %v3938_v47 = vpop.f32.mrf.mxu1  ;;  %v3940_v48 = vpop.f32.mrf.mxu0 }
 0x1d5   : > { %v3942_v51 = vpop.f32.mrf.mxu0  ;;  %v3944_v36 = vpop.f32.mrf.mxu1 }
 0x1d6   : > { %4088 = vst [vmem:[#allocation4_spill] sm:$0xff] %v3944_v36 }
 0x1d7   : > { %v3946_v54 = vpop.f32.mrf.mxu0  ;;  %v3948_v55 = vpop.f32.mrf.mxu1 }
 0x1d8   : > { %4089 = vst [vmem:[#allocation5_spill] sm:$0xff] %v3946_v54  ;;  %4090 = vst [vmem:[#allocation6_spill] sm:$0xff] %v3948_v55  ;;  %v2045_v54 = vadd.f32 %v1867_v18, %v3884_v46  ;;  %v2049_v46 = vadd.f32 %v1953_v26, %v3900_v61 }
 0x1d9   : > { %v3950_v58 = vpop.f32.mrf.mxu1  ;;  %v3952_v59 = vpop.f32.mrf.mxu0 }
 0x1da   : > { %4091 = vst [vmem:[#allocation7_spill] sm:$0xff] %v3950_v58  ;;  %4092 = vst [vmem:[#allocation8_spill] sm:$0xff] %v3952_v59 }
 0x1db   : > { %v3954_v62 = vpop.f32.mrf.mxu1  ;;  %v3297_v63 = vpop.f32.mrf.mxu0 }
 0x1dc   : > { %4093 = vst [vmem:[#allocation9_spill] sm:$0xff] %v3954_v62 }
 0x1dd   : > { %v3956_v3 = vpop.f32.mrf.mxu0  ;;  %v2463_v4 = vpop.f32.mrf.mxu1 }
 0x1de   : > { %4094 = vst [vmem:[#allocation10_spill] sm:$0xff] %v3956_v3 }
 0x1df   : > { %v3298_v7 = vpop.f32.mrf.mxu0  ;;  %v2465_v8 = vpop.f32.mrf.mxu1 }
 0x1e0   : > { %v2044_v7 = vadd.f32 %v1865_v15, %v3882_v44  ;;  %v2048_v44 = vadd.f32 %v1951_v24, %v3896_v57  ;;  %v2051_v57 = vadd.f32 %v3924_v30, %v3908_v6 }
 0x1e1   : > { %v2467_v11 = vpop.f32.mrf.mxu1  ;;  %v2506_v12 = vpop.f32.mrf.mxu0 }
 0x1e2   : > { %v2343_v36 = vadd.f32 %v2164_v37, %v2044_v7  ;;  %v4106_v7 = vld [vmem:[#allocation6_spill] sm:$0xff] }
 0x1e3   : > { %v2469_v14 = vpop.f32.mrf.mxu1  ;;  %v2508_v17 = vpop.f32.mrf.mxu0 }
 0x1e4   : > { %v2642_v18 = vadd.f32 %v2463_v4, %v2343_v36 }
 0x1e5   : > { %v2510_v34 = vpop.f32.mrf.mxu0  ;;  %v2549_v38 = vpop.f32.mrf.mxu1 }
 0x1e7   : > { %v3958_v35 = vpop.f32.mrf.mxu0  ;;  %v3960_v16 = vpop.f32.mrf.mxu1 }
 0x1e8   : > { %4095 = vst [vmem:[#allocation11_spill] sm:$0xff] %v3958_v35  ;;  %4096 = vst [vmem:[#allocation12_spill] sm:$0xff] %v3960_v16  ;;  %v2053_v35 = vadd.f32 %v1869_v19, %v3886_v49  ;;  %v2046_v16 = vadd.f32 %v1908_v20, %v3888_v50  ;;  %v2344_v49 = vadd.f32 %v2166_v39, %v2045_v54  ;;  %v3987_v50 = vpop.permute.xlu0 %2963 }
 0x1e9   : > { %v3962_v59 = vpop.f32.mrf.mxu1  ;;  %v3964_v62 = vpop.f32.mrf.mxu0 }
 0x1ea   : > { %4097 = vst [vmem:[#allocation13_spill] sm:$0xff] %v3964_v62  ;;  %v2054_v62 = vadd.f32 %v1871_v21, %v3890_v52  ;;  %v2057_v52 = vadd.f32 %v3918_v27, %v3902_v1  ;;  %v2352_v61 = vadd.f32 %v2168_v40, %v2053_v35  ;;  %v2345_v20 = vadd.f32 %v2207_v41, %v2046_v16 }
 0x1eb   : > { %v3966_v63 = vpop.f32.mrf.mxu1  ;;  %v3968_v3 = vpop.f32.mrf.mxu0  ;;  %v2643_v21 = vadd.f32 %v2465_v8, %v2344_v49  ;;  %v2059_v1 = vadd.f32 %v3926_v31, %v3910_v9 }
 0x1ec   : > { %4098 = vst [vmem:[#allocation14_spill] sm:$0xff] %v3966_v63  ;;  %4099 = vst [vmem:[#allocation15_spill] sm:$0xff] %v3968_v3  ;;  %v2047_v63 = vadd.f32 %v1910_v22, %v3892_v53  ;;  %v2055_v3 = vadd.f32 %v1912_v23, %v3894_v56  ;;  %v2050_v53 = vadd.f32 %v3920_v28, %v3904_v2  ;;  %v4009_v28 = vpop.permute.xlu1 %2968 }
 0x1ed   : > { %v3971_v58 = vpop.f32.mrf.mxu0  ;;  %v3973_v55 = vpop.f32.mrf.mxu1  ;;  %v2058_v56 = vadd.f32 %v3922_v29, %v3906_v5  ;;  %v2052_v2 = vadd.f32 %v3928_v32, %v3912_v10  ;;  %v2353_v5 = vadd.f32 %v2170_v42, %v2054_v62  ;;  %v2644_v16 = vadd.f32 %v2506_v12, %v2345_v20 }
 0x1ee   : > { %4100 = vst [vmem:[#allocation16_spill] sm:$0xff] %v3971_v58  ;;  %4101 = vst [vmem:[#allocation17_spill] sm:$0xff] %v3973_v55  ;;  %v2056_v55 = vadd.f32 %v1914_v25, %v3898_v60  ;;  %v2346_v6 = vadd.f32 %v2209_v43, %v2047_v63  ;;  %v2651_v25 = vadd.f32 %v2467_v11, %v2352_v61  ;;  %v4105_v63 = vld [vmem:[#allocation5_spill] sm:$0xff] }
 0x1ef   : > { %v3983_v15 = vpop.f32.mrf.mxu0  ;;  %v3303_v58 = vpop.f32.mrf.mxu1  ;;  %v2060_v29 = vadd.f32 %v3930_v33, %v3914_v13  ;;  %v2354_v9 = vadd.f32 %v3934_v0, %v2055_v3  ;;  %v2347_v10 = vadd.f32 %v3936_v45, %v2048_v44  ;;  %v2652_v30 = vadd.f32 %v2469_v14, %v2353_v5  ;;  %v4102_v3 = vld [vmem:[#allocation4_spill] sm:$0xff] }
 0x1f0   : > { %v2645_v35 = vadd.f32 %v2508_v17, %v2346_v6  ;;  %v2355_v41 = vadd.f32 %v3938_v47, %v2056_v55  ;;  %v2348_v42 = vadd.f32 %v3940_v48, %v2049_v46  ;;  %v2356_v62 = vadd.f32 %v3942_v51, %v2057_v52  ;;  %v4103_v47 = vld [vmem:[#allocation11_spill] sm:$0xff]  ;;  %v4104_v48 = vld [vmem:[#allocation12_spill] sm:$0xff] }
 0x1f1   : > { %v3997_v19 = vpop.f32.mrf.mxu1  ;;  %v2762_v60 = vpop.f32.mrf.mxu0  ;;  %v2653_v13 = vadd.f32 %v2510_v34, %v2354_v9  ;;  %v2646_v33 = vadd.f32 %v2549_v38, %v2347_v10  ;;  %v2349_v4 = vadd.f32 %v4102_v3, %v2050_v53  ;;  %v2357_v51 = vadd.f32 %v4105_v63, %v2058_v56  ;;  %v4107_v49 = vld [vmem:[#allocation13_spill] sm:$0xff]  ;;  %v4109_v5 = vld [vmem:[#allocation8_spill] sm:$0xff] }
 0x1f2   : > { %v2941_v22 = vadd.f32 %v2762_v60, %v2642_v18  ;;  %v2654_v55 = vadd.f32 %v4103_v47, %v2355_v41  ;;  %v2647_v8 = vadd.f32 %v4104_v48, %v2348_v42  ;;  %v2350_v44 = vadd.f32 %v4106_v7, %v2051_v57 }
 0x1f3   : > { %v2764_v23 = vpop.f32.mrf.mxu0  ;;  %v3304_v24 = vpop.f32.mrf.mxu1  ;;  %v2655_v46 = vadd.f32 %v3962_v59, %v2356_v62  ;;  %v2648_v18 = vadd.f32 %v4107_v49, %v2349_v4  ;;  %v2351_v57 = vadd.f32 %v4109_v5, %v2052_v2  ;;  %v4110_v6 = vld [vmem:[#allocation14_spill] sm:$0xff]  ;;  %v4114_v2 = vld [vmem:[#allocation9_spill] sm:$0xff] }
 0x1f4   : > { %v2942_v26 = vadd.f32 %v2764_v23, %v2643_v21  ;;  %v2971_v27 = vadd.f32 %v3987_v50, %v2941_v22  ;;  %v4108_v22 = vld [vmem:[#allocation7_spill] sm:$0xff]  ;;  %v2656_v59 = vadd.f32 %v4110_v6, %v2357_v51 }
 0x1f5   : > { %v2766_v31 = vpop.f32.mrf.mxu0  ;;  %v2805_v32 = vpop.f32.mrf.mxu1  ;;  %v2358_v56 = vadd.f32 %v4108_v22, %v2059_v1  ;;  %v4111_v23 = vld [vmem:[#allocation15_spill] sm:$0xff] }
 0x1f6   : > { %v2972_v37 = vadd.f32 %v3987_v50, %v2942_v26  ;;  %2989 = vst [vmem:[%s4002_s11] sm:$0xff] %v2971_v27  ;;  %v2950_v39 = vadd.f32 %v2766_v31, %v2651_v25  ;;  %v2943_v40 = vadd.f32 %v2805_v32, %v2644_v16  ;;  %v2649_v24 = vadd.f32 %v4111_v23, %v2350_v44  ;;  %v4113_v1 = vld [vmem:[#allocation3_spill] sm:$0xff] }
 0x1f7   : > { %v2768_v43 = vpop.f32.mrf.mxu0  ;;  %v2807_v0 = vpop.f32.mrf.mxu1  ;;  %v2359_v32 = vadd.f32 %v4114_v2, %v2060_v29 }
 0x1f8   : > { %2990 = vst [vmem:[%s4002_s11 + $0x8] sm:$0xff] %v2972_v37  ;;  %v2973_v45 = vadd.f32 %v3987_v50, %v2943_v40  ;;  %v2980_v36 = vadd.f32 %v4009_v28, %v2950_v39  ;;  %v2951_v54 = vadd.f32 %v2768_v43, %v2652_v30  ;;  %v2944_v58 = vadd.f32 %v2807_v0, %v2645_v35  ;;  %v4112_v30 = vld [vmem:[#allocation2_spill] sm:$0xff]  ;;  %v4115_v35 = vld [vmem:[#allocation16_spill] sm:$0xff]  ;;  %v4116_v39 = vld [vmem:[#allocation17_spill] sm:$0xff] }
 0x1f9   : > { %v2809_v11 = vpop.f32.mrf.mxu1  ;;  %v2848_v12 = vpop.f32.mrf.mxu0  ;;  %v2061_v31 = vadd.f32 %v4113_v1, %v4112_v30  ;;  %v2657_v37 = vadd.f32 %v4115_v35, %v2358_v56  ;;  %v2650_v40 = vadd.f32 %v4116_v39, %v2351_v57  ;;  %v2658_v29 = vadd.f32 %v3983_v15, %v2359_v32 }
 0x1fa   : > { %2991 = vst [vmem:[%s4002_s11 + $0x10] sm:$0xff] %v2973_v45  ;;  %2998 = vst [vmem:[%s4002_s11 + $0x48] sm:$0xf] %v2980_v36  ;;  %v2981_v14 = vadd.f32 %v4009_v28, %v2951_v54  ;;  %v2974_v17 = vadd.f32 %v3987_v50, %v2944_v58  ;;  %v2952_v34 = vadd.f32 %v2809_v11, %v2653_v13  ;;  %v4117_v45 = vld [vmem:[#allocation10_spill] sm:$0xff] }
 0x1fb   : > { %v2945_v38 = vadd.f32 %v2848_v12, %v2646_v33  ;;  %v2811_v52 = vpop.f32.mrf.mxu1  ;;  %v2850_v53 = vpop.f32.mrf.mxu0  ;;  %v2360_v36 = vadd.f32 %v4117_v45, %v2061_v31 }
 0x1fc   : > { %2999 = vst [vmem:[%s4002_s11 + $0x50] sm:$0xf] %v2981_v14  ;;  %2992 = vst [vmem:[%s4002_s11 + $0x18] sm:$0xff] %v2974_v17  ;;  %v2982_v60 = vadd.f32 %v4009_v28, %v2952_v34  ;;  %v2953_v20 = vadd.f32 %v2811_v52, %v2654_v55  ;;  %v2946_v21 = vadd.f32 %v2850_v53, %v2647_v8 }
 0x1fd   : > { %v2975_v61 = vadd.f32 %v3987_v50, %v2945_v38  ;;  %v2852_v25 = vpop.f32.mrf.mxu0  ;;  %v2891_v16 = vpop.f32.mrf.mxu1  ;;  %v2659_v8 = vadd.f32 %v3997_v19, %v2360_v36 }
 0x1fe   : > { %3000 = vst [vmem:[%s4002_s11 + $0x58] sm:$0xf] %v2982_v60  ;;  %v2983_v26 = vadd.f32 %v4009_v28, %v2953_v20  ;;  %v2976_v27 = vadd.f32 %v3987_v50, %v2946_v21  ;;  %v2954_v9 = vadd.f32 %v2852_v25, %v2655_v46  ;;  %v2947_v10 = vadd.f32 %v2891_v16, %v2648_v18 }
 0x1ff   : > { %2993 = vst [vmem:[%s4002_s11 + $0x20] sm:$0xff] %v2975_v61  ;;  %v2854_v41 = vpop.f32.mrf.mxu0  ;;  %v2893_v42 = vpop.f32.mrf.mxu1 }
 0x200   : > { %3001 = vst [vmem:[%s4002_s11 + $0x60] sm:$0xf] %v2983_v26  ;;  %2994 = vst [vmem:[%s4002_s11 + $0x28] sm:$0xff] %v2976_v27  ;;  %v2984_v13 = vadd.f32 %v4009_v28, %v2954_v9  ;;  %v2977_v33 = vadd.f32 %v3987_v50, %v2947_v10  ;;  %v2955_v43 = vadd.f32 %v2854_v41, %v2656_v59 }
 0x201   : > { %v2948_v0 = vadd.f32 %v2893_v42, %v2649_v24  ;;  %v2895_v54 = vpop.f32.mrf.mxu1  ;;  %v2934_v58 = vpop.f32.mrf.mxu0 }
 0x202   : > { %3002 = vst [vmem:[%s4002_s11 + $0x68] sm:$0xf] %v2984_v13  ;;  %2995 = vst [vmem:[%s4002_s11 + $0x30] sm:$0xff] %v2977_v33  ;;  %v2985_v62 = vadd.f32 %v4009_v28, %v2955_v43  ;;  %v2956_v4 = vadd.f32 %v2895_v54, %v2657_v37  ;;  %v2949_v47 = vadd.f32 %v2934_v58, %v2650_v40 }
 0x203   : > { %v2978_v3 = vadd.f32 %v3987_v50, %v2948_v0  ;;  %v2897_v55 = vpop.f32.mrf.mxu1  ;;  %v3309_v48 = vpop.f32.mrf.mxu0 }
 0x204   : > { %3003 = vst [vmem:[%s4002_s11 + $0x70] sm:$0xf] %v2985_v62  ;;  %v2986_v15 = vadd.f32 %v4009_v28, %v2956_v4  ;;  %v2979_v11 = vadd.f32 %v3987_v50, %v2949_v47  ;;  %v2957_v12 = vadd.f32 %v2897_v55, %v2658_v29 }
 0x205   : > { %2996 = vst [vmem:[%s4002_s11 + $0x38] sm:$0xff] %v2978_v3  ;;  %v2937_v14 = vpop.f32.mrf.mxu0 }
 0x206   : > { %3004 = vst [vmem:[%s4002_s11 + $0x78] sm:$0xf] %v2986_v15  ;;  %2997 = vst [vmem:[%s4002_s11 + $0x40] sm:$0xff] %v2979_v11  ;;  %v2987_v17 = vadd.f32 %v4009_v28, %v2957_v12  ;;  %v2958_v34 = vadd.f32 %v2937_v14, %v2659_v8 }
 0x207   : > { %v3310_v38 = vpop.f32.mrf.mxu0 }
 0x208   : > { %3005 = vst [vmem:[%s4002_s11 + $0x80] sm:$0xf] %v2987_v17  ;;  %v2988_v63 = vadd.f32 %v4009_v28, %v2958_v34 }
 0x20a   : > { %3006 = vst [vmem:[%s4002_s11 + $0x88] sm:$0xf] %v2988_v63 }
 0x20b PF: > { %s14_s17 = sadd.s32 1, %s3392_s17   ;;  %s4118_s15 = smov %s3388_s16 }
 0x20c   : > { %p11_p5 = scmp.ge.s32.totalorder %s14_s17, 4   ;;  %s4119_s16 = smov %s4121_s18 }
 0x20e   :  { %13 = sbr.rel (!%p11_p5) target bundleno = 2 (0x2), region = 77 }

</bundles_post_ra>
